<compile_context>
chip_gen: v5e
topology: v5e:2x2
jax: 0.10.0
libtpu: 0.0.40
codegen_flags: <defaults>
</compile_context>

<pallas_src>
import math
from functools import partial

import numpy as np
import jax
import jax.numpy as jnp
from jax import lax
from jax.experimental import pallas as pl
from jax.experimental.pallas import tpu as pltpu  # noqa: F401  (no grid / scratch / TPU params needed at these sizes)

NUM_HEADS = 4       # GMT default num_heads
NEG_INF = -1e9      # GMT padding-mask value
LN_EPS = 1e-5
BN_EPS = 1e-5
F32 = jnp.float32


def _dot(a, b):
    return jnp.dot(a, b, preferred_element_type=F32)


# ---------------------------------------------------------------------------
# Kernel 1: node stage
#   encoder -> GIN0 -> ReLU -> GIN1 -> GMT.lin1 -> GATConv(K), GATConv(V)
# ---------------------------------------------------------------------------
def _node_stage_kernel(
        x_ref, ahat_ref, adjsl_ref,
        enc_w, enc_b,
        g0_w0, g0_b0, g0_s0, g0_t0, g0_w1, g0_b1, g0_s1, g0_t1,
        g1_w0, g1_b0, g1_s0, g1_t0, g1_w1, g1_b1, g1_s1, g1_t1,
        lin1_w, lin1_b,
        gk_w, gk_asrc, gk_adst, gk_bias,
        gv_w, gv_asrc, gv_adst, gv_bias,
        k_out_ref, v_out_ref, *, slope):
    h = _dot(x_ref[...], enc_w[...]) + enc_b[...]                        # encoder

    # GINConv 0: MLP((A+I)h), MLP = Lin -> BN -> ReLU -> Lin -> BN (eval BN folded)
    agg = _dot(ahat_ref[...], h)
    h = jnp.maximum((_dot(agg, g0_w0[...]) + g0_b0[...]) * g0_s0[...] + g0_t0[...], 0.0)
    h = (_dot(h, g0_w1[...]) + g0_b1[...]) * g0_s1[...] + g0_t1[...]
    h = jnp.maximum(h, 0.0)                                              # inter-conv ReLU

    # GINConv 1
    agg = _dot(ahat_ref[...], h)
    h = jnp.maximum((_dot(agg, g1_w0[...]) + g1_b0[...]) * g1_s0[...] + g1_t0[...], 0.0)
    h = (_dot(h, g1_w1[...]) + g1_b1[...]) * g1_s1[...] + g1_t1[...]

    xl = _dot(h, lin1_w[...]) + lin1_b[...]                              # GMT lin1

    adj = adjsl_ref[...]                                                 # adjacency (+ self loops)

    def gat(w, asrc, adst, bias):
        # Dense single-head GATConv: projection + masked edge softmax + aggregation.
        xw = _dot(xl, w[...])                                            # [N, D]
        a_dst = _dot(xw, adst[...])                                      # [N, 1]
        a_src = lax.dot_general(asrc[...], xw, (((1,), (1,)), ((), ())),
                                preferred_element_type=F32)              # [1, N]
        e = a_dst + a_src                                                # [N, N]
        e = jnp.where(e > 0, e, slope * e)                               # LeakyReLU(0.2)
        e = jnp.where(adj > 0, e, NEG_INF)
        e = e - jnp.max(e, axis=-1, keepdims=True)
        p = jnp.exp(e) * adj                                             # exact zero off-graph
        p = p * pl.reciprocal(jnp.sum(p, axis=-1, keepdims=True), approx=False)
        return _dot(p, xw) + bias[...]

    k_out_ref[...] = gat(gk_w, gk_asrc, gk_adst, gk_bias)
    v_out_ref[...] = gat(gv_w, gv_asrc, gv_adst, gv_bias)


def node_stage(x, a_hat, adj_sl, params):
    n = x.shape[0]
    gmt = params["gmt"]
    d = gmt["lin1_w"].shape[1]
    g0, g1 = params["gin0"], params["gin1"]
    gk, gv = gmt["pma_g"]["gat_k"], gmt["pma_g"]["gat_v"]
    return pl.pallas_call(
        partial(_node_stage_kernel, slope=0.2),
        out_shape=(jax.ShapeDtypeStruct((n, d), F32),
                   jax.ShapeDtypeStruct((n, d), F32)),
    )(x, a_hat, adj_sl,
      params["enc_w"], params["enc_b"],
      g0["lin0_w"], g0["lin0_b"], g0["bn0_s"], g0["bn0_t"],
      g0["lin1_w"], g0["lin1_b"], g0["bn1_s"], g0["bn1_t"],
      g1["lin0_w"], g1["lin0_b"], g1["bn0_s"], g1["bn0_t"],
      g1["lin1_w"], g1["lin1_b"], g1["bn1_s"], g1["bn1_t"],
      gmt["lin1_w"], gmt["lin1_b"],
      gk["w"], gk["att_src"], gk["att_dst"], gk["bias"],
      gv["w"], gv["att_src"], gv["att_dst"], gv["bias"])


# ---------------------------------------------------------------------------
# Kernel 2: pooling head
#   (MAB0 = GMPool_G, MAB1 = SelfAtt, MAB2 = GMPool_I) per graph + lin2 + clf
# ---------------------------------------------------------------------------
def _gmt_head_kernel(*refs, starts, nk0, num_heads, scale, eps):
    it = iter(refs)

    def take(n):
        return [next(it)[...] for _ in range(n)]

    gat_k, gat_v = take(2)                           # [N_pad, D] node K / V features
    mask0, seed_mask, ones_small, ones_big = take(4) # masks + block-diag head selectors
    s0, s2 = take(2)                                 # seeds: [S_pad, D], [1, D]
    m0_qw, m0_qb, m0_ow, m0_ob, m0_g0, m0_b0, m0_g1, m0_b1 = take(8)
    (m1_qw, m1_qb, m1_kw, m1_kb, m1_vw, m1_vb, m1_ow, m1_ob,
     m1_g0, m1_b0, m1_g1, m1_b1) = take(12)
    (m2_qw, m2_qb, m2_kw, m2_kb, m2_vw, m2_vb, m2_ow, m2_ob,
     m2_g0, m2_b0, m2_g1, m2_b1) = take(12)
    lin2_w, lin2_b, clf_w, clf_b = take(4)
    o_ref = next(it)

    def ln(x, g, b):
        mu = jnp.mean(x, axis=-1, keepdims=True)
        xc = x - mu
        var = jnp.mean(xc * xc, axis=-1, keepdims=True)
        return xc * lax.rsqrt(var + eps) * g + b

    def attention(q, k, v, ones_bd, mask_row):
        # Block-masked multi-head attention: 3 matmuls total instead of 2*num_heads.
        # ones_bd is the [H*Nk, D] block-diagonal head selector (rows of head-block h
        # keep only head h's columns).
        kb = jnp.concatenate([k] * num_heads, axis=0) * ones_bd          # [H*Nk, D]
        vb = jnp.concatenate([v] * num_heads, axis=0) * ones_bd
        s = lax.dot_general(q, kb, (((1,), (1,)), ((), ())),
                            preferred_element_type=F32) * scale          # [Sq, H*Nk]
        if mask_row is not None:
            s = s + mask_row
        # row-global max subtraction: softmax-invariant, numerically safe
        s = s - jnp.max(s, axis=-1, keepdims=True)
        e = jnp.exp(s)
        o_un = _dot(e, vb)                    # [Sq, D] per-head unnormalized outputs
        denom = _dot(e, ones_bd)              # [Sq, D] per-head softmax sums (broadcast per head)
        return o_un * pl.reciprocal(denom, approx=False)

    def mab_tail(q, attn, ow, ob, g0, b0, g1, b1):
        out = ln(q + attn, g0, b0)                                       # +Q residual, ln0
        out = out + jnp.maximum(_dot(out, ow) + ob, 0.0)                 # + relu(fc_o(out))
        return ln(out, g1, b1)                                           # ln1

    # graph-independent queries (fc_q of the seed matrices) hoisted out of the loop
    q0 = _dot(s0, m0_qw) + m0_qb                                         # [S_pad, D]
    q2 = _dot(s2, m2_qw) + m2_qb                                         # [1, D]

    num_graphs = len(starts)
    d = lin2_w.shape[0]
    row_ids = lax.broadcasted_iota(jnp.int32, (num_graphs, 1), 0)
    pooled = jnp.zeros((num_graphs, d), F32)

    for g, start in enumerate(starts):                                   # unrolled over graphs
        # MAB 0 (GMPool_G): K/V = GATConv node features of this graph's aligned slot
        k0 = gat_k[start:start + nk0, :]
        v0 = gat_v[start:start + nk0, :]
        a0 = attention(q0, k0, v0, ones_small, mask0[g:g + 1, :])
        out0 = mab_tail(q0, a0, m0_ow, m0_ob, m0_g0, m0_b0, m0_g1, m0_b1)

        # MAB 1 (SelfAtt / SAB)
        q1 = _dot(out0, m1_qw) + m1_qb
        k1 = _dot(out0, m1_kw) + m1_kb
        v1 = _dot(out0, m1_vw) + m1_vb
        a1 = attention(q1, k1, v1, ones_big, seed_mask)
        out1 = mab_tail(q1, a1, m1_ow, m1_ob, m1_g0, m1_b0, m1_g1, m1_b1)

        # MAB 2 (GMPool_I, single seed)
        k2 = _dot(out1, m2_kw) + m2_kb
        v2 = _dot(out1, m2_vw) + m2_vb
        a2 = attention(q2, k2, v2, ones_big, seed_mask)
        out2 = mab_tail(q2, a2, m2_ow, m2_ob, m2_g0, m2_b0, m2_g1, m2_b1)  # [1, D]

        pooled = pooled + jnp.where(row_ids == g, 1.0, 0.0) * out2       # scatter row g

    y = _dot(pooled, lin2_w) + lin2_b                                    # GMT lin2
    o_ref[...] = _dot(y, clf_w) + clf_b                                  # clf (dropout eval = id)


def gmt_head(gat_k_out, gat_v_out, params, aux, num_graphs, out_channels):
    gmt = params["gmt"]
    m0, m1, m2 = gmt["pma_g"]["mab"], gmt["sab"]["mab"], gmt["pma_i"]["mab"]
    hidden = gmt["lin2_w"].shape[0]
    ops = [
        gat_k_out, gat_v_out,
        aux["mask_add"], aux["seed_mask"], aux["ones_small"], aux["ones_big"],
        gmt["pma_g"]["S"], gmt["pma_i"]["S"],
        m0["fc_q_w"], m0["fc_q_b"], m0["fc_o_w"], m0["fc_o_b"],
        m0["ln0_g"], m0["ln0_b"], m0["ln1_g"], m0["ln1_b"],
        m1["fc_q_w"], m1["fc_q_b"], m1["layer_k_w"], m1["layer_k_b"],
        m1["layer_v_w"], m1["layer_v_b"], m1["fc_o_w"], m1["fc_o_b"],
        m1["ln0_g"], m1["ln0_b"], m1["ln1_g"], m1["ln1_b"],
        m2["fc_q_w"], m2["fc_q_b"], m2["layer_k_w"], m2["layer_k_b"],
        m2["layer_v_w"], m2["layer_v_b"], m2["fc_o_w"], m2["fc_o_b"],
        m2["ln0_g"], m2["ln0_b"], m2["ln1_g"], m2["ln1_b"],
        gmt["lin2_w"], gmt["lin2_b"], params["clf_w"], params["clf_b"],
    ]
    return pl.pallas_call(
        partial(_gmt_head_kernel, starts=tuple(aux["starts"]), nk0=aux["nk0"],
                num_heads=NUM_HEADS, scale=1.0 / math.sqrt(hidden), eps=LN_EPS),
        out_shape=jax.ShapeDtypeStruct((num_graphs, out_channels), F32),
    )(*ops)


def gtr_forward(params, x, a_hat, adj_sl, aux, num_graphs, out_channels):
    gat_k_out, gat_v_out = node_stage(x, a_hat, adj_sl, params)
    return gmt_head(gat_k_out, gat_v_out, params, aux, num_graphs, out_channels)


# ---------------------------------------------------------------------------
# Host-side (one-time) setup: parameters and batch bookkeeping
# ---------------------------------------------------------------------------
def build_batch_aux(sizes, hidden, num_heads, num_seeds):
    """Per-graph slot starts, additive key masks and block-diagonal head selectors
    (all built once with numpy — no per-forward host ops)."""
    hd = hidden // num_heads
    nk0 = int(math.ceil(max(sizes) / 8.0)) * 8            # 8-row-aligned per-graph slot
    b = len(sizes)

    mask = np.zeros((b, num_heads * nk0), np.float32)     # key mask for MAB0
    for g, cnt in enumerate(sizes):
        row = np.where(np.arange(nk0) < cnt, 0.0, NEG_INF).astype(np.float32)
        mask[g] = np.tile(row, num_heads)

    s_pad = int(math.ceil(num_seeds / 8.0)) * 8            # padded seed count
    srow = np.where(np.arange(s_pad) < num_seeds, 0.0, NEG_INF).astype(np.float32)
    seed_mask = np.tile(srow, num_heads)[None, :]          # key mask for MAB1/MAB2

    def block_diag(nk):
        m = np.zeros((num_heads * nk, hidden), np.float32)
        for h in range(num_heads):
            m[h * nk:(h + 1) * nk, h * hd:(h + 1) * hd] = 1.0
        return jnp.asarray(m)

    return dict(
        nk0=nk0,
        starts=tuple(g * nk0 for g in range(b)),
        mask_add=jnp.asarray(mask),
        seed_mask=jnp.asarray(seed_mask),
        ones_small=block_diag(nk0),
        ones_big=block_diag(s_pad),
    )


def init_params(key, c_in, hidden, c_out, num_seeds):
    keys = iter(jax.random.split(key, 64))
    nk = lambda: next(keys)

    def lin(din, dout):
        bound = 1.0 / math.sqrt(din)
        w = jax.random.uniform(nk(), (din, dout), F32, -bound, bound)
        b = jax.random.uniform(nk(), (dout,), F32, -bound, bound).reshape(1, dout)
        return w, b

    def bn_fold(d, eps=BN_EPS):
        # eval-mode BatchNorm1d folded into per-channel scale/shift (default running stats)
        gamma = jnp.ones((d,), F32)
        beta = jnp.zeros((d,), F32)
        mean = jnp.zeros((d,), F32)
        var = jnp.ones((d,), F32)
        s = gamma / jnp.sqrt(var + eps)
        t = beta - mean * s
        return s.reshape(1, d), t.reshape(1, d)

    def ln_p(d):
        return jnp.ones((1, d), F32), jnp.zeros((1, d), F32)

    def gat(din, dout):
        a = math.sqrt(6.0 / (din + dout))
        return dict(
            w=jax.random.uniform(nk(), (din, dout), F32, -a, a),
            att_src=jax.random.uniform(nk(), (1, dout), F32, -a, a),
            att_dst=jax.random.uniform(nk(), (dout, 1), F32, -a, a),
            bias=jnp.zeros((1, dout), F32))

    def mab(d, with_kv_linear):
        p = {}
        p["fc_q_w"], p["fc_q_b"] = lin(d, d)
        if with_kv_linear:
            p["layer_k_w"], p["layer_k_b"] = lin(d, d)
            p["layer_v_w"], p["layer_v_b"] = lin(d, d)
        p["fc_o_w"], p["fc_o_b"] = lin(d, d)
        p["ln0_g"], p["ln0_b"] = ln_p(d)
        p["ln1_g"], p["ln1_b"] = ln_p(d)
        return p

    def gin(din, h):
        p = {}
        p["lin0_w"], p["lin0_b"] = lin(din, h)
        p["lin1_w"], p["lin1_b"] = lin(h, h)
        p["bn0_s"], p["bn0_t"] = bn_fold(h)
        p["bn1_s"], p["bn1_t"] = bn_fold(h)
        return p

    params = {}
    params["enc_w"], params["enc_b"] = lin(c_in, hidden)
    params["gin0"] = gin(hidden, hidden)
    params["gin1"] = gin(hidden, hidden)

    seed_a = math.sqrt(6.0 / (num_seeds + hidden))
    s_pad = int(math.ceil(num_seeds / 8.0)) * 8
    s0 = jax.random.uniform(nk(), (num_seeds, hidden), F32, -seed_a, seed_a)
    if s_pad > num_seeds:                 # zero-pad seeds to an 8-row multiple (masked in-kernel)
        s0 = jnp.concatenate([s0, jnp.zeros((s_pad - num_seeds, hidden), F32)], axis=0)

    gmt = {}
    gmt["lin1_w"], gmt["lin1_b"] = lin(hidden, hidden)
    gmt["lin2_w"], gmt["lin2_b"] = lin(hidden, hidden)
    gmt["pma_g"] = dict(S=s0, gat_k=gat(hidden, hidden), gat_v=gat(hidden, hidden),
                        mab=mab(hidden, with_kv_linear=False))
    gmt["sab"] = dict(mab=mab(hidden, with_kv_linear=True))
    gmt["pma_i"] = dict(
        S=jax.random.uniform(nk(), (1, hidden), F32, -seed_a, seed_a),
        mab=mab(hidden, with_kv_linear=True))
    params["gmt"] = gmt

    params["clf_w"], params["clf_b"] = lin(hidden, c_out)
    return params


if __name__ == "__main__":
    IN_CHANNELS, HIDDEN, OUT_CHANNELS = 16, 32, 10
    NUM_SEEDS = math.ceil(300 * 0.25)                     # legacy PyG GMT defaults -> 75 seeds

    key = jax.random.PRNGKey(0)
    k_param, k_x = jax.random.split(key)
    params = init_params(k_param, IN_CHANNELS, HIDDEN, OUT_CHANNELS, NUM_SEEDS)

    # Synthetic batched graph: 3 graphs of sizes 7/6/7, bidirectional chain edges.
    # Each graph occupies an 8-row-aligned slot of the node array (padding rows are
    # isolated, zero-featured, and masked out of the pooling attention).
    sizes = [7, 6, 7]
    num_graphs = len(sizes)
    aux = build_batch_aux(sizes, HIDDEN, NUM_HEADS, NUM_SEEDS)
    nk0 = aux["nk0"]
    n_pad = num_graphs * nk0

    x_real = np.asarray(jax.random.normal(k_x, (sum(sizes), IN_CHANNELS), F32))
    x_np = np.zeros((n_pad, IN_CHANNELS), np.float32)
    rows = np.concatenate([g * nk0 + np.arange(s) for g, s in enumerate(sizes)])
    x_np[rows] = x_real

    adj_np = np.zeros((n_pad, n_pad), np.float32)         # adj[dst, src]
    for g, s in enumerate(sizes):
        base = g * nk0
        for i in range(s - 1):
            adj_np[base + i + 1, base + i] += 1.0
            adj_np[base + i, base + i + 1] += 1.0
    eye = np.eye(n_pad, dtype=np.float32)

    x = jnp.asarray(x_np, dtype=F32)
    a_hat = jnp.asarray(adj_np + eye, dtype=F32)                      # GIN: (1+eps)*x + sum_j x_j, eps=0
    adj_self_loops = jnp.asarray(np.minimum(adj_np + eye, 1.0), dtype=F32)  # GAT adds self-loops

    out = gtr_forward(params, x, a_hat, adj_self_loops, aux, num_graphs, OUT_CHANNELS)
    out = jax.block_until_ready(out)
    assert out.shape == (num_graphs, OUT_CHANNELS)
    assert bool(jnp.all(jnp.isfinite(out)))
    print("KERNEL_OK")
</pallas_src>

<mosaic_0001>
module attributes {stable_mosaic.version = 11 : i64} {
  func.func @_node_stage_kernel(%arg0: memref<24x16xf32, #tpu.memory_space<vmem>>, %arg1: memref<24x24xf32, #tpu.memory_space<vmem>>, %arg2: memref<24x24xf32, #tpu.memory_space<vmem>>, %arg3: memref<16x32xf32, #tpu.memory_space<vmem>>, %arg4: memref<1x32xf32, #tpu.memory_space<vmem>>, %arg5: memref<32x32xf32, #tpu.memory_space<vmem>>, %arg6: memref<1x32xf32, #tpu.memory_space<vmem>>, %arg7: memref<1x32xf32, #tpu.memory_space<vmem>>, %arg8: memref<1x32xf32, #tpu.memory_space<vmem>>, %arg9: memref<32x32xf32, #tpu.memory_space<vmem>>, %arg10: memref<1x32xf32, #tpu.memory_space<vmem>>, %arg11: memref<1x32xf32, #tpu.memory_space<vmem>>, %arg12: memref<1x32xf32, #tpu.memory_space<vmem>>, %arg13: memref<32x32xf32, #tpu.memory_space<vmem>>, %arg14: memref<1x32xf32, #tpu.memory_space<vmem>>, %arg15: memref<1x32xf32, #tpu.memory_space<vmem>>, %arg16: memref<1x32xf32, #tpu.memory_space<vmem>>, %arg17: memref<32x32xf32, #tpu.memory_space<vmem>>, %arg18: memref<1x32xf32, #tpu.memory_space<vmem>>, %arg19: memref<1x32xf32, #tpu.memory_space<vmem>>, %arg20: memref<1x32xf32, #tpu.memory_space<vmem>>, %arg21: memref<32x32xf32, #tpu.memory_space<vmem>>, %arg22: memref<1x32xf32, #tpu.memory_space<vmem>>, %arg23: memref<32x32xf32, #tpu.memory_space<vmem>>, %arg24: memref<1x32xf32, #tpu.memory_space<vmem>>, %arg25: memref<32x1xf32, #tpu.memory_space<vmem>>, %arg26: memref<1x32xf32, #tpu.memory_space<vmem>>, %arg27: memref<32x32xf32, #tpu.memory_space<vmem>>, %arg28: memref<1x32xf32, #tpu.memory_space<vmem>>, %arg29: memref<32x1xf32, #tpu.memory_space<vmem>>, %arg30: memref<1x32xf32, #tpu.memory_space<vmem>>, %arg31: memref<24x32xf32, #tpu.memory_space<vmem>>, %arg32: memref<24x32xf32, #tpu.memory_space<vmem>>) attributes {dimension_semantics = [], scalar_prefetch = 0 : i64, scratch_operands = 0 : i64, tpu.core_type = #tpu.core_type<tc>} {
    %c0 = arith.constant 0 : index
    %c0_0 = arith.constant 0 : index
    %0 = vector.load %arg0[%c0, %c0_0] : memref<24x16xf32, #tpu.memory_space<vmem>>, vector<24x16xf32>
    %c0_1 = arith.constant 0 : index
    %c0_2 = arith.constant 0 : index
    %1 = vector.load %arg3[%c0_1, %c0_2] : memref<16x32xf32, #tpu.memory_space<vmem>>, vector<16x32xf32>
    %cst = arith.constant dense<0.000000e+00> : vector<24x32xf32>
    %2 = tpu.matmul %0, %1, %cst {dimension_numbers = #tpu.dot_dimension_numbers<[1], [0], [0], [1], [0, 0, 1, 1], [], []>} : vector<24x16xf32>, vector<16x32xf32>, vector<24x32xf32> -> vector<24x32xf32>
    %c0_3 = arith.constant 0 : index
    %c0_4 = arith.constant 0 : index
    %3 = vector.load %arg4[%c0_3, %c0_4] : memref<1x32xf32, #tpu.memory_space<vmem>>, vector<1x32xf32>
    %4 = vector.broadcast %3 : vector<1x32xf32> to vector<24x32xf32>
    %5 = arith.addf %2, %4 : vector<24x32xf32>
    %c0_5 = arith.constant 0 : index
    %c0_6 = arith.constant 0 : index
    %6 = vector.load %arg1[%c0_5, %c0_6] : memref<24x24xf32, #tpu.memory_space<vmem>>, vector<24x24xf32>
    %cst_7 = arith.constant dense<0.000000e+00> : vector<24x32xf32>
    %7 = tpu.matmul %6, %5, %cst_7 {dimension_numbers = #tpu.dot_dimension_numbers<[1], [0], [0], [1], [0, 0, 1, 1], [], []>} : vector<24x24xf32>, vector<24x32xf32>, vector<24x32xf32> -> vector<24x32xf32>
    %c0_8 = arith.constant 0 : index
    %c0_9 = arith.constant 0 : index
    %8 = vector.load %arg5[%c0_8, %c0_9] : memref<32x32xf32, #tpu.memory_space<vmem>>, vector<32x32xf32>
    %cst_10 = arith.constant dense<0.000000e+00> : vector<24x32xf32>
    %9 = tpu.matmul %7, %8, %cst_10 {dimension_numbers = #tpu.dot_dimension_numbers<[1], [0], [0], [1], [0, 0, 1, 1], [], []>} : vector<24x32xf32>, vector<32x32xf32>, vector<24x32xf32> -> vector<24x32xf32>
    %c0_11 = arith.constant 0 : index
    %c0_12 = arith.constant 0 : index
    %10 = vector.load %arg6[%c0_11, %c0_12] : memref<1x32xf32, #tpu.memory_space<vmem>>, vector<1x32xf32>
    %11 = vector.broadcast %10 : vector<1x32xf32> to vector<24x32xf32>
    %12 = arith.addf %9, %11 : vector<24x32xf32>
    %c0_13 = arith.constant 0 : index
    %c0_14 = arith.constant 0 : index
    %13 = vector.load %arg7[%c0_13, %c0_14] : memref<1x32xf32, #tpu.memory_space<vmem>>, vector<1x32xf32>
    %14 = vector.broadcast %13 : vector<1x32xf32> to vector<24x32xf32>
    %15 = arith.mulf %12, %14 : vector<24x32xf32>
    %c0_15 = arith.constant 0 : index
    %c0_16 = arith.constant 0 : index
    %16 = vector.load %arg8[%c0_15, %c0_16] : memref<1x32xf32, #tpu.memory_space<vmem>>, vector<1x32xf32>
    %17 = vector.broadcast %16 : vector<1x32xf32> to vector<24x32xf32>
    %18 = arith.addf %15, %17 : vector<24x32xf32>
    %cst_17 = arith.constant 0.000000e+00 : f32
    %19 = vector.broadcast %cst_17 : f32 to vector<24x32xf32>
    %20 = arith.maximumf %18, %19 : vector<24x32xf32>
    %c0_18 = arith.constant 0 : index
    %c0_19 = arith.constant 0 : index
    %21 = vector.load %arg9[%c0_18, %c0_19] : memref<32x32xf32, #tpu.memory_space<vmem>>, vector<32x32xf32>
    %cst_20 = arith.constant dense<0.000000e+00> : vector<24x32xf32>
    %22 = tpu.matmul %20, %21, %cst_20 {dimension_numbers = #tpu.dot_dimension_numbers<[1], [0], [0], [1], [0, 0, 1, 1], [], []>} : vector<24x32xf32>, vector<32x32xf32>, vector<24x32xf32> -> vector<24x32xf32>
    %c0_21 = arith.constant 0 : index
    %c0_22 = arith.constant 0 : index
    %23 = vector.load %arg10[%c0_21, %c0_22] : memref<1x32xf32, #tpu.memory_space<vmem>>, vector<1x32xf32>
    %24 = vector.broadcast %23 : vector<1x32xf32> to vector<24x32xf32>
    %25 = arith.addf %22, %24 : vector<24x32xf32>
    %c0_23 = arith.constant 0 : index
    %c0_24 = arith.constant 0 : index
    %26 = vector.load %arg11[%c0_23, %c0_24] : memref<1x32xf32, #tpu.memory_space<vmem>>, vector<1x32xf32>
    %27 = vector.broadcast %26 : vector<1x32xf32> to vector<24x32xf32>
    %28 = arith.mulf %25, %27 : vector<24x32xf32>
    %c0_25 = arith.constant 0 : index
    %c0_26 = arith.constant 0 : index
    %29 = vector.load %arg12[%c0_25, %c0_26] : memref<1x32xf32, #tpu.memory_space<vmem>>, vector<1x32xf32>
    %30 = vector.broadcast %29 : vector<1x32xf32> to vector<24x32xf32>
    %31 = arith.addf %28, %30 : vector<24x32xf32>
    %cst_27 = arith.constant 0.000000e+00 : f32
    %32 = vector.broadcast %cst_27 : f32 to vector<24x32xf32>
    %33 = arith.maximumf %31, %32 : vector<24x32xf32>
    %c0_28 = arith.constant 0 : index
    %c0_29 = arith.constant 0 : index
    %34 = vector.load %arg1[%c0_28, %c0_29] : memref<24x24xf32, #tpu.memory_space<vmem>>, vector<24x24xf32>
    %cst_30 = arith.constant dense<0.000000e+00> : vector<24x32xf32>
    %35 = tpu.matmul %34, %33, %cst_30 {dimension_numbers = #tpu.dot_dimension_numbers<[1], [0], [0], [1], [0, 0, 1, 1], [], []>} : vector<24x24xf32>, vector<24x32xf32>, vector<24x32xf32> -> vector<24x32xf32>
    %c0_31 = arith.constant 0 : index
    %c0_32 = arith.constant 0 : index
    %36 = vector.load %arg13[%c0_31, %c0_32] : memref<32x32xf32, #tpu.memory_space<vmem>>, vector<32x32xf32>
    %cst_33 = arith.constant dense<0.000000e+00> : vector<24x32xf32>
    %37 = tpu.matmul %35, %36, %cst_33 {dimension_numbers = #tpu.dot_dimension_numbers<[1], [0], [0], [1], [0, 0, 1, 1], [], []>} : vector<24x32xf32>, vector<32x32xf32>, vector<24x32xf32> -> vector<24x32xf32>
    %c0_34 = arith.constant 0 : index
    %c0_35 = arith.constant 0 : index
    %38 = vector.load %arg14[%c0_34, %c0_35] : memref<1x32xf32, #tpu.memory_space<vmem>>, vector<1x32xf32>
    %39 = vector.broadcast %38 : vector<1x32xf32> to vector<24x32xf32>
    %40 = arith.addf %37, %39 : vector<24x32xf32>
    %c0_36 = arith.constant 0 : index
    %c0_37 = arith.constant 0 : index
    %41 = vector.load %arg15[%c0_36, %c0_37] : memref<1x32xf32, #tpu.memory_space<vmem>>, vector<1x32xf32>
    %42 = vector.broadcast %41 : vector<1x32xf32> to vector<24x32xf32>
    %43 = arith.mulf %40, %42 : vector<24x32xf32>
    %c0_38 = arith.constant 0 : index
    %c0_39 = arith.constant 0 : index
    %44 = vector.load %arg16[%c0_38, %c0_39] : memref<1x32xf32, #tpu.memory_space<vmem>>, vector<1x32xf32>
    %45 = vector.broadcast %44 : vector<1x32xf32> to vector<24x32xf32>
    %46 = arith.addf %43, %45 : vector<24x32xf32>
    %cst_40 = arith.constant 0.000000e+00 : f32
    %47 = vector.broadcast %cst_40 : f32 to vector<24x32xf32>
    %48 = arith.maximumf %46, %47 : vector<24x32xf32>
    %c0_41 = arith.constant 0 : index
    %c0_42 = arith.constant 0 : index
    %49 = vector.load %arg17[%c0_41, %c0_42] : memref<32x32xf32, #tpu.memory_space<vmem>>, vector<32x32xf32>
    %cst_43 = arith.constant dense<0.000000e+00> : vector<24x32xf32>
    %50 = tpu.matmul %48, %49, %cst_43 {dimension_numbers = #tpu.dot_dimension_numbers<[1], [0], [0], [1], [0, 0, 1, 1], [], []>} : vector<24x32xf32>, vector<32x32xf32>, vector<24x32xf32> -> vector<24x32xf32>
    %c0_44 = arith.constant 0 : index
    %c0_45 = arith.constant 0 : index
    %51 = vector.load %arg18[%c0_44, %c0_45] : memref<1x32xf32, #tpu.memory_space<vmem>>, vector<1x32xf32>
    %52 = vector.broadcast %51 : vector<1x32xf32> to vector<24x32xf32>
    %53 = arith.addf %50, %52 : vector<24x32xf32>
    %c0_46 = arith.constant 0 : index
    %c0_47 = arith.constant 0 : index
    %54 = vector.load %arg19[%c0_46, %c0_47] : memref<1x32xf32, #tpu.memory_space<vmem>>, vector<1x32xf32>
    %55 = vector.broadcast %54 : vector<1x32xf32> to vector<24x32xf32>
    %56 = arith.mulf %53, %55 : vector<24x32xf32>
    %c0_48 = arith.constant 0 : index
    %c0_49 = arith.constant 0 : index
    %57 = vector.load %arg20[%c0_48, %c0_49] : memref<1x32xf32, #tpu.memory_space<vmem>>, vector<1x32xf32>
    %58 = vector.broadcast %57 : vector<1x32xf32> to vector<24x32xf32>
    %59 = arith.addf %56, %58 : vector<24x32xf32>
    %c0_50 = arith.constant 0 : index
    %c0_51 = arith.constant 0 : index
    %60 = vector.load %arg21[%c0_50, %c0_51] : memref<32x32xf32, #tpu.memory_space<vmem>>, vector<32x32xf32>
    %cst_52 = arith.constant dense<0.000000e+00> : vector<24x32xf32>
    %61 = tpu.matmul %59, %60, %cst_52 {dimension_numbers = #tpu.dot_dimension_numbers<[1], [0], [0], [1], [0, 0, 1, 1], [], []>} : vector<24x32xf32>, vector<32x32xf32>, vector<24x32xf32> -> vector<24x32xf32>
    %c0_53 = arith.constant 0 : index
    %c0_54 = arith.constant 0 : index
    %62 = vector.load %arg22[%c0_53, %c0_54] : memref<1x32xf32, #tpu.memory_space<vmem>>, vector<1x32xf32>
    %63 = vector.broadcast %62 : vector<1x32xf32> to vector<24x32xf32>
    %64 = arith.addf %61, %63 : vector<24x32xf32>
    %c0_55 = arith.constant 0 : index
    %c0_56 = arith.constant 0 : index
    %65 = vector.load %arg2[%c0_55, %c0_56] : memref<24x24xf32, #tpu.memory_space<vmem>>, vector<24x24xf32>
    %c0_57 = arith.constant 0 : index
    %c0_58 = arith.constant 0 : index
    %66 = vector.load %arg23[%c0_57, %c0_58] : memref<32x32xf32, #tpu.memory_space<vmem>>, vector<32x32xf32>
    %cst_59 = arith.constant dense<0.000000e+00> : vector<24x32xf32>
    %67 = tpu.matmul %64, %66, %cst_59 {dimension_numbers = #tpu.dot_dimension_numbers<[1], [0], [0], [1], [0, 0, 1, 1], [], []>} : vector<24x32xf32>, vector<32x32xf32>, vector<24x32xf32> -> vector<24x32xf32>
    %c0_60 = arith.constant 0 : index
    %c0_61 = arith.constant 0 : index
    %68 = vector.load %arg25[%c0_60, %c0_61] : memref<32x1xf32, #tpu.memory_space<vmem>>, vector<32x1xf32>
    %cst_62 = arith.constant dense<0.000000e+00> : vector<24x1xf32>
    %69 = tpu.matmul %67, %68, %cst_62 {dimension_numbers = #tpu.dot_dimension_numbers<[1], [0], [0], [1], [0, 0, 1, 1], [], []>} : vector<24x32xf32>, vector<32x1xf32>, vector<24x1xf32> -> vector<24x1xf32>
    %c0_63 = arith.constant 0 : index
    %c0_64 = arith.constant 0 : index
    %70 = vector.load %arg24[%c0_63, %c0_64] : memref<1x32xf32, #tpu.memory_space<vmem>>, vector<1x32xf32>
    %cst_65 = arith.constant dense<0.000000e+00> : vector<1x24xf32>
    %71 = tpu.matmul %70, %67, %cst_65 {dimension_numbers = #tpu.dot_dimension_numbers<[1], [1], [0], [0], [0, 0, 1, 0], [], []>} : vector<1x32xf32>, vector<24x32xf32>, vector<1x24xf32> -> vector<1x24xf32>
    %72 = vector.broadcast %69 : vector<24x1xf32> to vector<24x24xf32>
    %73 = vector.broadcast %71 : vector<1x24xf32> to vector<24x24xf32>
    %74 = arith.addf %72, %73 : vector<24x24xf32>
    %cst_66 = arith.constant 0.000000e+00 : f32
    %75 = vector.broadcast %cst_66 : f32 to vector<24x24xf32>
    %76 = arith.cmpf ogt, %74, %75 : vector<24x24xf32>
    %cst_67 = arith.constant 2.000000e-01 : f32
    %77 = vector.broadcast %cst_67 : f32 to vector<24x24xf32>
    %78 = arith.mulf %77, %74 : vector<24x24xf32>
    %79 = arith.select %76, %74, %78 : vector<24x24xi1>, vector<24x24xf32>
    %cst_68 = arith.constant 0.000000e+00 : f32
    %80 = vector.broadcast %cst_68 : f32 to vector<24x24xf32>
    %81 = arith.cmpf ogt, %65, %80 : vector<24x24xf32>
    %cst_69 = arith.constant -1.000000e+09 : f32
    %82 = vector.broadcast %cst_69 : f32 to vector<24x24xf32>
    %83 = arith.select %81, %79, %82 : vector<24x24xi1>, vector<24x24xf32>
    %cst_70 = arith.constant dense<0xFF800000> : vector<24xf32>
    %84 = vector.multi_reduction <maximumf>, %83, %cst_70 [1] : vector<24x24xf32> to vector<24xf32>
    %85 = vector.shape_cast %84 : vector<24xf32> to vector<24x1xf32>
    %86 = vector.broadcast %85 : vector<24x1xf32> to vector<24x24xf32>
    %87 = arith.subf %83, %86 : vector<24x24xf32>
    %88 = math.exp %87 : vector<24x24xf32>
    %89 = arith.mulf %88, %65 : vector<24x24xf32>
    %cst_71 = arith.constant dense<0.000000e+00> : vector<24xf32>
    %90 = vector.multi_reduction <add>, %89, %cst_71 [1] : vector<24x24xf32> to vector<24xf32>
    %91 = vector.shape_cast %90 : vector<24xf32> to vector<24x1xf32>
    %92 = tpu.reciprocal %91 : vector<24x1xf32> -> vector<24x1xf32>
    %93 = vector.broadcast %92 : vector<24x1xf32> to vector<24x24xf32>
    %94 = arith.mulf %89, %93 : vector<24x24xf32>
    %cst_72 = arith.constant dense<0.000000e+00> : vector<24x32xf32>
    %95 = tpu.matmul %94, %67, %cst_72 {dimension_numbers = #tpu.dot_dimension_numbers<[1], [0], [0], [1], [0, 0, 1, 1], [], []>} : vector<24x24xf32>, vector<24x32xf32>, vector<24x32xf32> -> vector<24x32xf32>
    %c0_73 = arith.constant 0 : index
    %c0_74 = arith.constant 0 : index
    %96 = vector.load %arg26[%c0_73, %c0_74] : memref<1x32xf32, #tpu.memory_space<vmem>>, vector<1x32xf32>
    %97 = vector.broadcast %96 : vector<1x32xf32> to vector<24x32xf32>
    %98 = arith.addf %95, %97 : vector<24x32xf32>
    %c0_75 = arith.constant 0 : index
    %c0_76 = arith.constant 0 : index
    %99 = vector.load %arg31[%c0_75, %c0_76] : memref<24x32xf32, #tpu.memory_space<vmem>>, vector<24x32xf32>
    tpu.vector_store %arg31[%c0_75, %c0_76], %98 {strides = array<i32>} : memref<24x32xf32, #tpu.memory_space<vmem>>, vector<24x32xf32>,
    %c0_77 = arith.constant 0 : index
    %c0_78 = arith.constant 0 : index
    %100 = vector.load %arg27[%c0_77, %c0_78] : memref<32x32xf32, #tpu.memory_space<vmem>>, vector<32x32xf32>
    %cst_79 = arith.constant dense<0.000000e+00> : vector<24x32xf32>
    %101 = tpu.matmul %64, %100, %cst_79 {dimension_numbers = #tpu.dot_dimension_numbers<[1], [0], [0], [1], [0, 0, 1, 1], [], []>} : vector<24x32xf32>, vector<32x32xf32>, vector<24x32xf32> -> vector<24x32xf32>
    %c0_80 = arith.constant 0 : index
    %c0_81 = arith.constant 0 : index
    %102 = vector.load %arg29[%c0_80, %c0_81] : memref<32x1xf32, #tpu.memory_space<vmem>>, vector<32x1xf32>
    %cst_82 = arith.constant dense<0.000000e+00> : vector<24x1xf32>
    %103 = tpu.matmul %101, %102, %cst_82 {dimension_numbers = #tpu.dot_dimension_numbers<[1], [0], [0], [1], [0, 0, 1, 1], [], []>} : vector<24x32xf32>, vector<32x1xf32>, vector<24x1xf32> -> vector<24x1xf32>
    %c0_83 = arith.constant 0 : index
    %c0_84 = arith.constant 0 : index
    %104 = vector.load %arg28[%c0_83, %c0_84] : memref<1x32xf32, #tpu.memory_space<vmem>>, vector<1x32xf32>
    %cst_85 = arith.constant dense<0.000000e+00> : vector<1x24xf32>
    %105 = tpu.matmul %104, %101, %cst_85 {dimension_numbers = #tpu.dot_dimension_numbers<[1], [1], [0], [0], [0, 0, 1, 0], [], []>} : vector<1x32xf32>, vector<24x32xf32>, vector<1x24xf32> -> vector<1x24xf32>
    %106 = vector.broadcast %103 : vector<24x1xf32> to vector<24x24xf32>
    %107 = vector.broadcast %105 : vector<1x24xf32> to vector<24x24xf32>
    %108 = arith.addf %106, %107 : vector<24x24xf32>
    %cst_86 = arith.constant 0.000000e+00 : f32
    %109 = vector.broadcast %cst_86 : f32 to vector<24x24xf32>
    %110 = arith.cmpf ogt, %108, %109 : vector<24x24xf32>
    %cst_87 = arith.constant 2.000000e-01 : f32
    %111 = vector.broadcast %cst_87 : f32 to vector<24x24xf32>
    %112 = arith.mulf %111, %108 : vector<24x24xf32>
    %113 = arith.select %110, %108, %112 : vector<24x24xi1>, vector<24x24xf32>
    %cst_88 = arith.constant 0.000000e+00 : f32
    %114 = vector.broadcast %cst_88 : f32 to vector<24x24xf32>
    %115 = arith.cmpf ogt, %65, %114 : vector<24x24xf32>
    %cst_89 = arith.constant -1.000000e+09 : f32
    %116 = vector.broadcast %cst_89 : f32 to vector<24x24xf32>
    %117 = arith.select %115, %113, %116 : vector<24x24xi1>, vector<24x24xf32>
    %cst_90 = arith.constant dense<0xFF800000> : vector<24xf32>
    %118 = vector.multi_reduction <maximumf>, %117, %cst_90 [1] : vector<24x24xf32> to vector<24xf32>
    %119 = vector.shape_cast %118 : vector<24xf32> to vector<24x1xf32>
    %120 = vector.broadcast %119 : vector<24x1xf32> to vector<24x24xf32>
    %121 = arith.subf %117, %120 : vector<24x24xf32>
    %122 = math.exp %121 : vector<24x24xf32>
    %123 = arith.mulf %122, %65 : vector<24x24xf32>
    %cst_91 = arith.constant dense<0.000000e+00> : vector<24xf32>
    %124 = vector.multi_reduction <add>, %123, %cst_91 [1] : vector<24x24xf32> to vector<24xf32>
    %125 = vector.shape_cast %124 : vector<24xf32> to vector<24x1xf32>
    %126 = tpu.reciprocal %125 : vector<24x1xf32> -> vector<24x1xf32>
    %127 = vector.broadcast %126 : vector<24x1xf32> to vector<24x24xf32>
    %128 = arith.mulf %123, %127 : vector<24x24xf32>
    %cst_92 = arith.constant dense<0.000000e+00> : vector<24x32xf32>
    %129 = tpu.matmul %128, %101, %cst_92 {dimension_numbers = #tpu.dot_dimension_numbers<[1], [0], [0], [1], [0, 0, 1, 1], [], []>} : vector<24x24xf32>, vector<24x32xf32>, vector<24x32xf32> -> vector<24x32xf32>
    %c0_93 = arith.constant 0 : index
    %c0_94 = arith.constant 0 : index
    %130 = vector.load %arg30[%c0_93, %c0_94] : memref<1x32xf32, #tpu.memory_space<vmem>>, vector<1x32xf32>
    %131 = vector.broadcast %130 : vector<1x32xf32> to vector<24x32xf32>
    %132 = arith.addf %129, %131 : vector<24x32xf32>
    %c0_95 = arith.constant 0 : index
    %c0_96 = arith.constant 0 : index
    %133 = vector.load %arg32[%c0_95, %c0_96] : memref<24x32xf32, #tpu.memory_space<vmem>>, vector<24x32xf32>
    tpu.vector_store %arg32[%c0_95, %c0_96], %132 {strides = array<i32>} : memref<24x32xf32, #tpu.memory_space<vmem>>, vector<24x32xf32>,
    return
  }
}

</mosaic_0001>

<bundles_post_ra>
// kernel: tpu_custom_call.1
= control target key start
LH: loop header
LB: loop body
LE: loop exit
PB: predicated region body
PF: predicated region fallthrough
CT: control target
= control target key end

     0   :  { %s2173_s6 = smov 1   ;;  %s2174_s10 = smov 2   ;;  %s2671_s0 = inlined_call_operand.smem [shape: u32[33], index: -1, kind: input, shape index: {}] }
   0x1   :  { %s2240_s5 = sld [smem:[%s2671_s0]]   ;;  %s2175_s14 = smov 3  }
   0x2   :  { %s2245_s9 = sld [smem:[%s2671_s0 + %s2173_s6]]   ;;  %s2176_s18 = smov 4  }
   0x3   :  { %s2250_s13 = sld [smem:[%s2671_s0 + %s2174_s10]]   ;;  %s2177_s22 = smov 5  }
   0x4   :  { %s2255_s17 = sld [smem:[%s2671_s0 + %s2175_s14]]   ;;  %s2178_s26 = smov 6  }
   0x5   :  { %s2260_s21 = sld [smem:[%s2671_s0 + %s2176_s18]]   ;;  %s2179_s30 = smov 7  }
   0x6   :  { %s2265_s25 = sld [smem:[%s2671_s0 + %s2177_s22]]   ;;  %s2180_s4 = smov 8  }
   0x7   :  { %2686 = sst [smem:[#allocation54_spill]] %s2240_s5  ;;  %s2181_s10 = smov 9  }
   0x8   :  { %s2270_s29 = sld [smem:[%s2671_s0 + %s2178_s26]]   ;;  %s2182_s15 = smov 10  }
   0x9   :  { %s2275_s3 = sld [smem:[%s2671_s0 + %s2179_s30]]   ;;  %s2183_s20 = smov 11  }
   0xa   :  { %s2280_s8 = sld [smem:[%s2671_s0 + %s2180_s4]]   ;;  %s2184_s26 = smov 12  }
   0xb   :  { %s2285_s14 = sld [smem:[%s2671_s0 + %s2181_s10]]   ;;  %s2185_s1 = smov 13  }
   0xc   :  { %2687 = sst [smem:[#allocation55_spill]] %s2265_s25  ;;  %s2186_s7 = smov 14  }
   0xd   :  { %s2290_s19 = sld [smem:[%s2671_s0 + %s2182_s15]]   ;;  %s2187_s15 = smov 15  }
   0xe   :  { %s2295_s24 = sld [smem:[%s2671_s0 + %s2183_s20]]   ;;  %s2188_s22 = smov 16  }
   0xf   :  { %s2300_s30 = sld [smem:[%s2671_s0 + %s2184_s26]]   ;;  %s2189_s28 = smov 17  }
  0x10   :  { %s2305_s6 = sld [smem:[%s2671_s0 + %s2185_s1]]  }
  0x11   :  { %2688 = sst [smem:[#allocation56_spill]] %s2285_s14 }
  0x12   :  { %s2310_s12 = sld [smem:[%s2671_s0 + %s2186_s7]]   ;;  %s2190_s7 = smov 18  }
  0x13   :  { %s2315_s20 = sld [smem:[%s2671_s0 + %s2187_s15]]   ;;  %s2191_s15 = smov 19  }
  0x14   :  { %2689 = sst [smem:[#allocation57_spill]] %s2295_s24 }
  0x15   :  { %s2320_s27 = sld [smem:[%s2671_s0 + %s2188_s22]]   ;;  %s2192_s22 = smov 20  }
  0x16   :  { %2690 = sst [smem:[#allocation58_spill]] %s2305_s6 }
  0x17   :  { %s2325_s4 = sld [smem:[%s2671_s0 + %s2189_s28]]   ;;  %s2193_s28 = smov 21  }
  0x18   :  { %2691 = sst [smem:[#allocation59_spill]] %s2310_s12 }
  0x19   :  { %s2330_s6 = sld [smem:[%s2671_s0 + %s2190_s7]]   ;;  %s2194_s7 = smov 22  }
  0x1a   :  { %s2335_s14 = sld [smem:[%s2671_s0 + %s2191_s15]]   ;;  %s2195_s15 = smov 23  }
  0x1b   :  { %2692 = sst [smem:[#allocation60_spill]] %s2320_s27 }
  0x1c   :  { %s2340_s25 = sld [smem:[%s2671_s0 + %s2192_s22]]   ;;  %s2196_s22 = smov 24  }
  0x1d   :  { %s2345_s5 = sld [smem:[%s2671_s0 + %s2193_s28]]   ;;  %s2197_s28 = smov 25  }
  0x1e   :  { %s2355_s27 = sld [smem:[%s2671_s0 + %s2195_s15]]   ;;  %s2199_s15 = smov 27  }
  0x1f   :  { %2693 = sst [smem:[#allocation61_spill]] %s2330_s6 }
  0x20   :  { %s2350_s6 = sld [smem:[%s2671_s0 + %s2194_s7]]   ;;  %s2198_s7 = smov 26  }
  0x21   :  { %s2365_s12 = sld [smem:[%s2671_s0 + %s2197_s28]]   ;;  %s2201_s28 = smov 29  }
  0x22   :  { %2694 = sst [smem:[#allocation62_spill]] %s2340_s25 }
  0x23   :  { %s2360_s25 = sld [smem:[%s2671_s0 + %s2196_s22]]   ;;  %s2200_s22 = smov 28  }
  0x24   :  { %s2375_s24 = sld [smem:[%s2671_s0 + %s2199_s15]]   ;;  %s2203_s15 = smov 31  }
  0x26   :  { %2695 = sst [smem:[#allocation63_spill]] %s2350_s6 }
  0x27   :  { %2697 = sst [smem:[#allocation65_spill]] %s2365_s12 }
  0x28   :  { %s2370_s6 = sld [smem:[%s2671_s0 + %s2198_s7]]   ;;  %s2202_s7 = smov 30  }
  0x29   :  { %2696 = sst [smem:[#allocation64_spill]] %s2360_s25 }
  0x2a   :  { %2699 = sst [smem:[#allocation67_spill]] %s2375_s24 }
  0x2b   :  { %s2380_s25 = sld [smem:[%s2671_s0 + %s2200_s22]]   ;;  %s2204_s22 = smov 32  }
  0x2c   :  { %s2385_s12 = sld [smem:[%s2671_s0 + %s2201_s28]]  }
  0x2d   :  { %s2395_s24 = sld [smem:[%s2671_s0 + %s2203_s15]]  }
  0x2e   :  { %2698 = sst [smem:[#allocation66_spill]] %s2370_s6 }
  0x2f   :  { %s2390_s6 = sld [smem:[%s2671_s0 + %s2202_s7]]  }
  0x31   :  { %2700 = sst [smem:[#allocation68_spill]] %s2380_s25 }
  0x32   :  { %s2400_s25 = sld [smem:[%s2671_s0 + %s2204_s22]]  }
  0x33   :  { %71 = vsyncpa [#allocation3], 0 }
  0x34   :  { %72 = vsyncpa [#allocation6], 0 }
  0x35   :  { %73 = vsyncpa [#allocation9], 0 }
  0x36   :  { %74 = vsyncpa [#allocation12], 0 }
  0x37   :  { %75 = vsyncpa [#allocation15], 0 }
  0x38   :  { %76 = vsyncpa [#allocation18], 0 }
  0x39   :  { %77 = vsyncpa [#allocation21], 0 }
  0x3a   :  { %78 = vsyncpa [#allocation24], 0 }
  0x3b   :  { %79 = vsyncpa [#allocation27], 0 }
  0x3c   :  { %80 = vsyncpa [#allocation30], 0 }
  0x3d   :  { %81 = vsyncpa [#allocation33], 0 }
  0x3e   :  { %82 = vsyncpa [#allocation36], 0 }
  0x3f   :  { %83 = vsyncpa [#allocation4], 0 }
  0x40   :  { %84 = vsyncpa [#allocation39], 0  ;;  %s104_s0 = sshll.u32 %s2250_s13, 4  ;;  %s2205_s28 = smov [#allocation5]   ;;  %s105_s0 = int_to_ptr.hbm [resolvable:$true] %s104_s0 }
  0x41   :  { %s106_s1 = sshll.u32 %s2205_s28, 4  ;;  %s131_s2 = sshll.u32 %s2260_s21, 4  ;;  %s107_s1 = int_to_ptr.vmem [resolvable:$true] %s106_s1  ;;  %s132_s2 = int_to_ptr.hbm [resolvable:$true] %s131_s2 }
  0x42   :  { %s1569_s7 = sshra.s32 %s105_s0, 4  ;;  %s1573_s11 = scalar_lea.hbm %s2250_s13, 24  ;;  %s1570_s7 = int_to_ptr.hbm [resolvable:$true] %s1569_s7 }
  0x43   :  { %s1571_s10 = scalar_lea.hbm %s1570_s7, 24  ;;  %p1574_p1 = scmp.lt.s32.totalorder %s1570_s7, %s2250_s13 }
  0x44   :  { %p1572_p0 = scmp.ne.s32.totalorder %s1570_s7, %s1571_s10  ;;  %p1575_p2 = scmp.lt.s32.totalorder %s1573_s11, %s1571_s10 }
  0x46   :  { %p1576_p3 = por %p1575_p2, %p1574_p1 }
  0x48   :  { %p1577_p4 = pnand %p1576_p3, %p1572_p0 }
  0x4a   :  { %1580 = shalt.err (!%p1577_p4)
}
  0x4b   :  { %s2206_s15 = smov 128   ;;  %s2207_s16 = smov 8  }
  0x4c   :  { %112 = dma.hbm_to_vmem [thread:$0]  %s105_s0, 384, %s107_s1, [#allocation6], %s2206_s15, %s2206_s15, %s2207_s16  }
  0x4d   :  { %s2208_s18 = smov [#allocation8]   ;;  %s155_s23 = sshll.u32 %s2275_s3, 4  ;;  %s156_s23 = int_to_ptr.hbm [resolvable:$true] %s155_s23 }
  0x4e   :  { %s133_s22 = sshll.u32 %s2208_s18, 4  ;;  %s1593_s13 = sshra.s32 %s132_s2, 4  ;;  %s134_s22 = int_to_ptr.vmem [resolvable:$true] %s133_s22  ;;  %s1594_s13 = int_to_ptr.hbm [resolvable:$true] %s1593_s13 }
  0x4f   :  { %s1595_s26 = scalar_lea.hbm %s1594_s13, 1  ;;  %s1597_s28 = scalar_lea.hbm %s2260_s21, 1 }
  0x50   :  { %p1596_p5 = scmp.ne.s32.totalorder %s1594_s13, %s1595_s26  ;;  %p1598_p6 = scmp.lt.s32.totalorder %s1594_s13, %s2260_s21 }
  0x51   :  { %p1599_p7 = scmp.lt.s32.totalorder %s1597_s28, %s1595_s26 }
  0x53   :  { %p1600_p8 = por %p1599_p7, %p1598_p6 }
  0x55   :  { %p1601_p9 = pnand %p1600_p8, %p1596_p5 }
  0x57   :  { %1604 = shalt.err (!%p1601_p9)
}
  0x58   :  { %136 = dma.hbm_to_vmem [thread:$0]  %s132_s2, 16, %s134_s22, [#allocation9]  }
  0x59   :  { %s179_s0 = sshll.u32 %s2290_s19, 4  ;;  %s2209_s1 = smov [#allocation11]   ;;  %s180_s0 = int_to_ptr.hbm [resolvable:$true] %s179_s0 }
  0x5a   :  { %s157_s7 = sshll.u32 %s2209_s1, 4  ;;  %s1617_s10 = sshra.s32 %s156_s23, 4  ;;  %s158_s7 = int_to_ptr.vmem [resolvable:$true] %s157_s7  ;;  %s1618_s10 = int_to_ptr.hbm [resolvable:$true] %s1617_s10 }
  0x5b   :  { %s1619_s11 = scalar_lea.hbm %s1618_s10, 1  ;;  %s1621_s18 = scalar_lea.hbm %s2275_s3, 1 }
  0x5c   :  { %p1620_p10 = scmp.ne.s32.totalorder %s1618_s10, %s1619_s11  ;;  %p1622_p11 = scmp.lt.s32.totalorder %s1618_s10, %s2275_s3 }
  0x5d   :  { %p1623_p12 = scmp.lt.s32.totalorder %s1621_s18, %s1619_s11 }
  0x5f   :  { %p1624_p13 = por %p1623_p12, %p1622_p11 }
  0x61   :  { %p1625_p0 = pnand %p1624_p13, %p1620_p10 }
  0x63   :  { %1628 = shalt.err (!%p1625_p0)
}
  0x64   :  { %160 = dma.hbm_to_vmem [thread:$0]  %s156_s23, 16, %s158_s7, [#allocation12]  }
  0x65   :  { %s2210_s21 = smov [#allocation14]   ;;  %s201_s22 = sshll.u32 %s2300_s30, 4  ;;  %s202_s22 = int_to_ptr.hbm [resolvable:$true] %s201_s22 }
  0x66   :  { %s181_s2 = sshll.u32 %s2210_s21, 4  ;;  %s1641_s13 = sshra.s32 %s180_s0, 4  ;;  %s182_s2 = int_to_ptr.vmem [resolvable:$true] %s181_s2  ;;  %s1642_s13 = int_to_ptr.hbm [resolvable:$true] %s1641_s13 }
  0x67   :  { %s1643_s26 = scalar_lea.hbm %s1642_s13, 1  ;;  %s1645_s28 = scalar_lea.hbm %s2290_s19, 1 }
  0x68   :  { %p1644_p1 = scmp.ne.s32.totalorder %s1642_s13, %s1643_s26  ;;  %p1646_p2 = scmp.lt.s32.totalorder %s1642_s13, %s2290_s19 }
  0x69   :  { %p1647_p3 = scmp.lt.s32.totalorder %s1645_s28, %s1643_s26 }
  0x6b   :  { %p1648_p4 = por %p1647_p3, %p1646_p2 }
  0x6d   :  { %p1649_p5 = pnand %p1648_p4, %p1644_p1 }
  0x6f   :  { %1652 = shalt.err (!%p1649_p5)
}
  0x70   :  { %184 = dma.hbm_to_vmem [thread:$0]  %s180_s0, 16, %s182_s2, [#allocation15]  }
  0x71   :  { %s225_s3 = sshll.u32 %s2315_s20, 4  ;;  %s2211_s23 = smov [#allocation17]   ;;  %s226_s3 = int_to_ptr.hbm [resolvable:$true] %s225_s3 }
  0x72   :  { %s203_s1 = sshll.u32 %s2211_s23, 4  ;;  %s1665_s7 = sshra.s32 %s202_s22, 4  ;;  %s204_s1 = int_to_ptr.vmem [resolvable:$true] %s203_s1  ;;  %s1666_s7 = int_to_ptr.hbm [resolvable:$true] %s1665_s7 }
  0x73   :  { %s1667_s10 = scalar_lea.hbm %s1666_s7, 1  ;;  %s1669_s11 = scalar_lea.hbm %s2300_s30, 1 }
  0x74   :  { %p1668_p6 = scmp.ne.s32.totalorder %s1666_s7, %s1667_s10  ;;  %p1670_p7 = scmp.lt.s32.totalorder %s1666_s7, %s2300_s30 }
  0x75   :  { %p1671_p8 = scmp.lt.s32.totalorder %s1669_s11, %s1667_s10 }
  0x77   :  { %p1672_p9 = por %p1671_p8, %p1670_p7 }
  0x79   :  { %p1673_p10 = pnand %p1672_p9, %p1668_p6 }
  0x7b   :  { %1676 = shalt.err (!%p1673_p10)
}
  0x7c   :  { %206 = dma.hbm_to_vmem [thread:$0]  %s202_s22, 16, %s204_s1, [#allocation18]  }
  0x7d   :  { %s2212_s19 = smov [#allocation20]   ;;  %s246_s18 = sshll.u32 %s2325_s4, 4  ;;  %s2422_s18 = int_to_ptr.hbm [resolvable:$true] %s246_s18 }
  0x7e   :  { %s227_s0 = sshll.u32 %s2212_s19, 4  ;;  %s1689_s21 = sshra.s32 %s226_s3, 4  ;;  %s228_s0 = int_to_ptr.vmem [resolvable:$true] %s227_s0  ;;  %s1690_s21 = int_to_ptr.hbm [resolvable:$true] %s1689_s21 }
  0x7f   :  { %s1691_s2 = scalar_lea.hbm %s1690_s21, 1  ;;  %s1693_s13 = scalar_lea.hbm %s2315_s20, 1 }
  0x80   :  { %p1692_p11 = scmp.ne.s32.totalorder %s1690_s21, %s1691_s2  ;;  %p1694_p12 = scmp.lt.s32.totalorder %s1690_s21, %s2315_s20 }
  0x81   :  { %p1695_p13 = scmp.lt.s32.totalorder %s1693_s13, %s1691_s2 }
  0x83   :  { %p1696_p0 = por %p1695_p13, %p1694_p12 }
  0x85   :  { %p1697_p1 = pnand %p1696_p0, %p1692_p11 }
  0x87   :  { %1700 = shalt.err (!%p1697_p1)
}
  0x88   :  { %230 = dma.hbm_to_vmem [thread:$0]  %s226_s3, 16, %s228_s0, [#allocation21]  }
  0x89   :  { %s271_s30 = sshll.u32 %s2335_s14, 4  ;;  %s2213_s22 = smov [#allocation23]   ;;  %s272_s30 = int_to_ptr.hbm [resolvable:$true] %s271_s30 }
  0x8a   :  { %s248_s26 = sshll.u32 %s2213_s22, 4  ;;  %s1713_s28 = sshra.s32 %s2422_s18, 4  ;;  %s249_s26 = int_to_ptr.vmem [resolvable:$true] %s248_s26  ;;  %s1714_s28 = int_to_ptr.hbm [resolvable:$true] %s1713_s28 }
  0x8b   :  { %s1715_s23 = scalar_lea.hbm %s1714_s28, 32  ;;  %s1717_s1 = scalar_lea.hbm %s2325_s4, 32 }
  0x8c   :  { %p1716_p2 = scmp.ne.s32.totalorder %s1714_s28, %s1715_s23  ;;  %p1718_p3 = scmp.lt.s32.totalorder %s1714_s28, %s2325_s4 }
  0x8d   :  { %p1719_p4 = scmp.lt.s32.totalorder %s1717_s1, %s1715_s23 }
  0x8f   :  { %p1720_p5 = por %p1719_p4, %p1718_p3 }
  0x91   :  { %p1721_p6 = pnand %p1720_p5, %p1716_p2 }
  0x93   :  { %1724 = shalt.err (!%p1721_p6)
}
  0x94   :  { %254 = dma.hbm_to_vmem [thread:$0]  %s2422_s18, 512, %s249_s26, [#allocation24], %s2206_s15, %s2206_s15, %s2207_s16  }
  0x95   :  { %s2214_s20 = smov [#allocation26]   ;;  %s292_s7 = sshll.u32 %s2345_s5, 4  ;;  %s2435_s7 = int_to_ptr.hbm [resolvable:$true] %s292_s7 }
  0x96   :  { %s273_s3 = sshll.u32 %s2214_s20, 4  ;;  %s1737_s10 = sshra.s32 %s272_s30, 4  ;;  %s274_s3 = int_to_ptr.vmem [resolvable:$true] %s273_s3  ;;  %s1738_s10 = int_to_ptr.hbm [resolvable:$true] %s1737_s10 }
  0x97   :  { %s1739_s4 = scalar_lea.hbm %s1738_s10, 1  ;;  %s1741_s11 = scalar_lea.hbm %s2335_s14, 1 }
  0x98   :  { %p1740_p7 = scmp.ne.s32.totalorder %s1738_s10, %s1739_s4  ;;  %p1742_p8 = scmp.lt.s32.totalorder %s1738_s10, %s2335_s14 }
  0x99   :  { %p1743_p9 = scmp.lt.s32.totalorder %s1741_s11, %s1739_s4 }
  0x9b   :  { %p1744_p10 = por %p1743_p9, %p1742_p8 }
  0x9d   :  { %p1745_p11 = pnand %p1744_p10, %p1740_p7 }
  0x9f   :  { %1748 = shalt.err (!%p1745_p11)
}
  0xa0   :  { %276 = dma.hbm_to_vmem [thread:$0]  %s272_s30, 16, %s274_s3, [#allocation27]  }
  0xa1   :  { %s316_s19 = sshll.u32 %s2355_s27, 4  ;;  %s2215_s0 = smov [#allocation29]   ;;  %s2440_s19 = int_to_ptr.hbm [resolvable:$true] %s316_s19 }
  0xa2   :  { %s294_s18 = sshll.u32 %s2215_s0, 4  ;;  %s1761_s21 = sshra.s32 %s2435_s7, 4  ;;  %s295_s18 = int_to_ptr.vmem [resolvable:$true] %s294_s18  ;;  %s1762_s21 = int_to_ptr.hbm [resolvable:$true] %s1761_s21 }
  0xa3   :  { %s1763_s2 = scalar_lea.hbm %s1762_s21, 32  ;;  %s1765_s14 = scalar_lea.hbm %s2345_s5, 32 }
  0xa4   :  { %p1764_p12 = scmp.ne.s32.totalorder %s1762_s21, %s1763_s2  ;;  %p1766_p13 = scmp.lt.s32.totalorder %s1762_s21, %s2345_s5 }
  0xa5   :  { %p1767_p0 = scmp.lt.s32.totalorder %s1765_s14, %s1763_s2 }
  0xa7   :  { %p1768_p1 = por %p1767_p0, %p1766_p13 }
  0xa9   :  { %p1769_p2 = pnand %p1768_p1, %p1764_p12 }
  0xab   :  { %1772 = shalt.err (!%p1769_p2)
}
  0xac   :  { %300 = dma.hbm_to_vmem [thread:$0]  %s2435_s7, 512, %s295_s18, [#allocation30], %s2206_s15, %s2206_s15, %s2207_s16  }
  0xad   :  { %s2216_s13 = smov [#allocation32]   ;;  %s91_s22 = sshll.u32 %s2245_s9, 4  ;;  %s2450_s22 = int_to_ptr.hbm [resolvable:$true] %s91_s22 }
  0xae   :  { %s318_s30 = sshll.u32 %s2216_s13, 4  ;;  %s1785_s5 = sshra.s32 %s2440_s19, 4  ;;  %s319_s30 = int_to_ptr.vmem [resolvable:$true] %s318_s30  ;;  %s1786_s5 = int_to_ptr.hbm [resolvable:$true] %s1785_s5 }
  0xaf   :  { %s1787_s26 = scalar_lea.hbm %s1786_s5, 32  ;;  %s1789_s28 = scalar_lea.hbm %s2355_s27, 32 }
  0xb0   :  { %p1788_p3 = scmp.ne.s32.totalorder %s1786_s5, %s1787_s26  ;;  %p1790_p4 = scmp.lt.s32.totalorder %s1786_s5, %s2355_s27 }
  0xb1   :  { %p1791_p5 = scmp.lt.s32.totalorder %s1789_s28, %s1787_s26 }
  0xb3   :  { %p1792_p6 = por %p1791_p5, %p1790_p4 }
  0xb5   :  { %p1793_p7 = pnand %p1792_p6, %p1788_p3 }
  0xb7   :  { %1796 = shalt.err (!%p1793_p7)
}
  0xb8   :  { %324 = dma.hbm_to_vmem [thread:$0]  %s2440_s19, 512, %s319_s30, [#allocation33], %s2206_s15, %s2206_s15, %s2207_s16  }
  0xb9   :  { %s117_s23 = sshll.u32 %s2255_s17, 4  ;;  %s2217_s1 = smov [#allocation2]   ;;  %s2460_s23 = int_to_ptr.hbm [resolvable:$true] %s117_s23 }
  0xba   :  { %s93_s20 = sshll.u32 %s2217_s1, 4  ;;  %s1809_s27 = sshra.s32 %s2450_s22, 4  ;;  %s94_s20 = int_to_ptr.vmem [resolvable:$true] %s93_s20  ;;  %s1810_s27 = int_to_ptr.hbm [resolvable:$true] %s1809_s27 }
  0xbb   :  { %s1811_s3 = scalar_lea.hbm %s1810_s27, 24  ;;  %s1813_s7 = scalar_lea.hbm %s2245_s9, 24 }
  0xbc   :  { %p1812_p8 = scmp.ne.s32.totalorder %s1810_s27, %s1811_s3  ;;  %p1814_p9 = scmp.lt.s32.totalorder %s1810_s27, %s2245_s9 }
  0xbd   :  { %p1815_p10 = scmp.lt.s32.totalorder %s1813_s7, %s1811_s3 }
  0xbf   :  { %p1816_p11 = por %p1815_p10, %p1814_p9 }
  0xc1   :  { %p1817_p12 = pnand %p1816_p11, %p1812_p8 }
  0xc3   :  { %1820 = shalt.err (!%p1817_p12)
}
  0xc4   :  { %99 = dma.hbm_to_vmem [thread:$0]  %s2450_s22, 384, %s94_s20, [#allocation3], %s2206_s15, %s2206_s15, %s2207_s16  }
  0xc5   :  { %s2218_s10 = smov [#allocation7]   ;;  %s144_s11 = sshll.u32 %s2270_s29, 4  ;;  %s145_s11 = int_to_ptr.hbm [resolvable:$true] %s144_s11 }
  0xc6   :  { %s119_s4 = sshll.u32 %s2218_s10, 4  ;;  %s1833_s19 = sshra.s32 %s2460_s23, 4  ;;  %s120_s4 = int_to_ptr.vmem [resolvable:$true] %s119_s4  ;;  %s1834_s19 = int_to_ptr.hbm [resolvable:$true] %s1833_s19 }
  0xc7   :  { %s1835_s9 = scalar_lea.hbm %s1834_s19, 16  ;;  %s1837_s0 = scalar_lea.hbm %s2255_s17, 16 }
  0xc8   :  { %p1836_p13 = scmp.ne.s32.totalorder %s1834_s19, %s1835_s9  ;;  %p1838_p0 = scmp.lt.s32.totalorder %s1834_s19, %s2255_s17 }
  0xc9   :  { %p1839_p1 = scmp.lt.s32.totalorder %s1837_s0, %s1835_s9 }
  0xcb   :  { %p1840_p2 = por %p1839_p1, %p1838_p0 }
  0xcd   :  { %p1841_p3 = pnand %p1840_p2, %p1836_p13 }
  0xcf   :  { %1844 = shalt.err (!%p1841_p3)
}
  0xd0   :  { %125 = dma.hbm_to_vmem [thread:$0]  %s2460_s23, 256, %s120_s4, [#allocation6], %s2206_s15, %s2206_s15, %s2207_s16  }
  0xd1   :  { %s166_s18 = sshll.u32 %s2280_s8, 4  ;;  %s2219_s21 = smov [#allocation10]   ;;  %s167_s18 = int_to_ptr.hbm [resolvable:$true] %s166_s18 }
  0xd2   :  { %s146_s2 = sshll.u32 %s2219_s21, 4  ;;  %s1857_s14 = sshra.s32 %s145_s11, 4  ;;  %s147_s2 = int_to_ptr.vmem [resolvable:$true] %s146_s2  ;;  %s1858_s14 = int_to_ptr.hbm [resolvable:$true] %s1857_s14 }
  0xd3   :  { %s1859_s17 = scalar_lea.hbm %s1858_s14, 1  ;;  %s1861_s13 = scalar_lea.hbm %s2270_s29, 1 }
  0xd4   :  { %p1860_p4 = scmp.ne.s32.totalorder %s1858_s14, %s1859_s17  ;;  %p1862_p5 = scmp.lt.s32.totalorder %s1858_s14, %s2270_s29 }
  0xd5   :  { %p1863_p6 = scmp.lt.s32.totalorder %s1861_s13, %s1859_s17 }
  0xd7   :  { %p1864_p7 = por %p1863_p6, %p1862_p5 }
  0xd9   :  { %p1865_p8 = pnand %p1864_p7, %p1860_p4 }
  0xdb   :  { %1868 = shalt.err (!%p1865_p8)
}
  0xdc   :  { %149 = dma.hbm_to_vmem [thread:$0]  %s145_s11, 16, %s147_s2, [#allocation9]  }
  0xdd   :  { %s2701_s30 = sld [smem:[#allocation57_spill]]  ;;  %s2220_s22 = smov [#allocation13]  }
  0xde   :  { %s168_s5 = sshll.u32 %s2220_s22, 4  ;;  %s1881_s28 = sshra.s32 %s167_s18, 4  ;;  %s169_s5 = int_to_ptr.vmem [resolvable:$true] %s168_s5  ;;  %s1882_s28 = int_to_ptr.hbm [resolvable:$true] %s1881_s28 }
  0xdf   :  { %s1883_s23 = scalar_lea.hbm %s1882_s28, 1  ;;  %s1885_s1 = scalar_lea.hbm %s2280_s8, 1 }
  0xe0   :  { %p1884_p9 = scmp.ne.s32.totalorder %s1882_s28, %s1883_s23  ;;  %p1886_p10 = scmp.lt.s32.totalorder %s1882_s28, %s2280_s8 }
  0xe1   :  { %p1887_p11 = scmp.lt.s32.totalorder %s1885_s1, %s1883_s23 }
  0xe3   :  { %s190_s26 = sshll.u32 %s2701_s30, 4  ;;  %p1888_p12 = por %p1887_p11, %p1886_p10  ;;  %s191_s26 = int_to_ptr.hbm [resolvable:$true] %s190_s26 }
  0xe5   :  { %p1889_p13 = pnand %p1888_p12, %p1884_p9 }
  0xe7   :  { %1892 = shalt.err (!%p1889_p13)
}
  0xe8   :  { %171 = dma.hbm_to_vmem [thread:$0]  %s167_s18, 16, %s169_s5, [#allocation12]  }
  0xe9   :  { %s2702_s29 = sld [smem:[#allocation59_spill]]  ;;  %s2221_s27 = smov [#allocation16]  }
  0xea   :  { %s192_s3 = sshll.u32 %s2221_s27, 4  ;;  %s1905_s7 = sshra.s32 %s191_s26, 4  ;;  %s193_s3 = int_to_ptr.vmem [resolvable:$true] %s192_s3  ;;  %s1906_s7 = int_to_ptr.hbm [resolvable:$true] %s1905_s7 }
  0xeb   :  { %s1907_s10 = scalar_lea.hbm %s1906_s7, 1  ;;  %s1909_s4 = scalar_lea.hbm %s2701_s30, 1 }
  0xec   :  { %p1908_p0 = scmp.ne.s32.totalorder %s1906_s7, %s1907_s10  ;;  %p1910_p1 = scmp.lt.s32.totalorder %s1906_s7, %s2701_s30 }
  0xed   :  { %p1911_p2 = scmp.lt.s32.totalorder %s1909_s4, %s1907_s10 }
  0xef   :  { %s214_s20 = sshll.u32 %s2702_s29, 4  ;;  %p1912_p3 = por %p1911_p2, %p1910_p1  ;;  %s215_s20 = int_to_ptr.hbm [resolvable:$true] %s214_s20 }
  0xf1   :  { %p1913_p4 = pnand %p1912_p3, %p1908_p0 }
  0xf3   :  { %1916 = shalt.err (!%p1913_p4)
}
  0xf4   :  { %195 = dma.hbm_to_vmem [thread:$0]  %s191_s26, 16, %s193_s3, [#allocation15]  }
  0xf5   :  { %s2703_s8 = sld [smem:[#allocation60_spill]]  ;;  %s2222_s11 = smov [#allocation19]  }
  0xf6   :  { %s216_s19 = sshll.u32 %s2222_s11, 4  ;;  %s1929_s0 = sshra.s32 %s215_s20, 4  ;;  %s217_s19 = int_to_ptr.vmem [resolvable:$true] %s216_s19  ;;  %s1930_s0 = int_to_ptr.hbm [resolvable:$true] %s1929_s0 }
  0xf7   :  { %s1931_s18 = scalar_lea.hbm %s1930_s0, 1  ;;  %s1933_s21 = scalar_lea.hbm %s2702_s29, 1 }
  0xf8   :  { %p1932_p5 = scmp.ne.s32.totalorder %s1930_s0, %s1931_s18  ;;  %p1934_p6 = scmp.lt.s32.totalorder %s1930_s0, %s2702_s29 }
  0xf9   :  { %p1935_p7 = scmp.lt.s32.totalorder %s1933_s21, %s1931_s18 }
  0xfb   :  { %s236_s9 = sshll.u32 %s2703_s8, 4  ;;  %p1936_p8 = por %p1935_p7, %p1934_p6  ;;  %s237_s9 = int_to_ptr.hbm [resolvable:$true] %s236_s9 }
  0xfd   :  { %p1937_p9 = pnand %p1936_p8, %p1932_p5 }
  0xff   :  { %1940 = shalt.err (!%p1937_p9)
}
 0x100   :  { %219 = dma.hbm_to_vmem [thread:$0]  %s215_s20, 16, %s217_s19, [#allocation18]  }
 0x101   :  { %s2704_s2 = sld [smem:[#allocation61_spill]]  ;;  %s2223_s17 = smov [#allocation22]  }
 0x102   :  { %s238_s13 = sshll.u32 %s2223_s17, 4  ;;  %s1953_s30 = sshra.s32 %s237_s9, 4  ;;  %s239_s13 = int_to_ptr.vmem [resolvable:$true] %s238_s13  ;;  %s1954_s30 = int_to_ptr.hbm [resolvable:$true] %s1953_s30 }
 0x103   :  { %s1955_s22 = scalar_lea.hbm %s1954_s30, 1  ;;  %s1957_s5 = scalar_lea.hbm %s2703_s8, 1 }
 0x104   :  { %p1956_p10 = scmp.ne.s32.totalorder %s1954_s30, %s1955_s22  ;;  %p1958_p11 = scmp.lt.s32.totalorder %s1954_s30, %s2703_s8 }
 0x105   :  { %p1959_p12 = scmp.lt.s32.totalorder %s1957_s5, %s1955_s22 }
 0x107   :  { %s260_s14 = sshll.u32 %s2704_s2, 4  ;;  %p1960_p13 = por %p1959_p12, %p1958_p11  ;;  %s261_s14 = int_to_ptr.hbm [resolvable:$true] %s260_s14 }
 0x109   :  { %p1961_p0 = pnand %p1960_p13, %p1956_p10 }
 0x10b   :  { %1964 = shalt.err (!%p1961_p0)
}
 0x10c   :  { %241 = dma.hbm_to_vmem [thread:$0]  %s237_s9, 16, %s239_s13, [#allocation21]  }
 0x10d   :  { %s2705_s26 = sld [smem:[#allocation62_spill]]  ;;  %s2224_s28 = smov [#allocation25]  }
 0x10e   :  { %s262_s23 = sshll.u32 %s2224_s28, 4  ;;  %s1977_s29 = sshra.s32 %s261_s14, 4  ;;  %s263_s23 = int_to_ptr.vmem [resolvable:$true] %s262_s23  ;;  %s1978_s29 = int_to_ptr.hbm [resolvable:$true] %s1977_s29 }
 0x10f   :  { %s1979_s20 = scalar_lea.hbm %s1978_s29, 1  ;;  %s1981_s27 = scalar_lea.hbm %s2704_s2, 1 }
 0x110   :  { %p1980_p1 = scmp.ne.s32.totalorder %s1978_s29, %s1979_s20  ;;  %p1982_p2 = scmp.lt.s32.totalorder %s1978_s29, %s2704_s2 }
 0x111   :  { %p1983_p3 = scmp.lt.s32.totalorder %s1981_s27, %s1979_s20 }
 0x113   :  { %s282_s1 = sshll.u32 %s2705_s26, 4  ;;  %p1984_p4 = por %p1983_p3, %p1982_p2  ;;  %s283_s1 = int_to_ptr.hbm [resolvable:$true] %s282_s1 }
 0x115   :  { %p1985_p5 = pnand %p1984_p4, %p1980_p1 }
 0x117   :  { %1988 = shalt.err (!%p1985_p5)
}
 0x118   :  { %265 = dma.hbm_to_vmem [thread:$0]  %s261_s14, 16, %s263_s23, [#allocation24]  }
 0x119   :  { %s2706_s3 = sld [smem:[#allocation63_spill]]  ;;  %s2225_s10 = smov [#allocation28]  }
 0x11a   :  { %s284_s4 = sshll.u32 %s2225_s10, 4  ;;  %s2001_s8 = sshra.s32 %s283_s1, 4  ;;  %s285_s4 = int_to_ptr.vmem [resolvable:$true] %s284_s4  ;;  %s2002_s8 = int_to_ptr.hbm [resolvable:$true] %s2001_s8 }
 0x11b   :  { %s2003_s11 = scalar_lea.hbm %s2002_s8, 1  ;;  %s2005_s19 = scalar_lea.hbm %s2705_s26, 1 }
 0x11c   :  { %p2004_p6 = scmp.ne.s32.totalorder %s2002_s8, %s2003_s11  ;;  %p2006_p7 = scmp.lt.s32.totalorder %s2002_s8, %s2705_s26 }
 0x11d   :  { %p2007_p8 = scmp.lt.s32.totalorder %s2005_s19, %s2003_s11 }
 0x11f   :  { %s306_s7 = sshll.u32 %s2706_s3, 4  ;;  %p2008_p9 = por %p2007_p8, %p2006_p7  ;;  %s307_s7 = int_to_ptr.hbm [resolvable:$true] %s306_s7 }
 0x121   :  { %p2009_p10 = pnand %p2008_p9, %p2004_p6 }
 0x123   :  { %2012 = shalt.err (!%p2009_p10)
}
 0x124   :  { %287 = dma.hbm_to_vmem [thread:$0]  %s283_s1, 16, %s285_s4, [#allocation27]  }
 0x125   :  { %s2707_s9 = sld [smem:[#allocation64_spill]]  ;;  %s2226_s0 = smov [#allocation31]  }
 0x126   :  { %s308_s18 = sshll.u32 %s2226_s0, 4  ;;  %s2025_s2 = sshra.s32 %s307_s7, 4  ;;  %s309_s18 = int_to_ptr.vmem [resolvable:$true] %s308_s18  ;;  %s2026_s2 = int_to_ptr.hbm [resolvable:$true] %s2025_s2 }
 0x127   :  { %s2027_s14 = scalar_lea.hbm %s2026_s2, 1  ;;  %s2029_s17 = scalar_lea.hbm %s2706_s3, 1 }
 0x128   :  { %p2028_p11 = scmp.ne.s32.totalorder %s2026_s2, %s2027_s14  ;;  %p2030_p12 = scmp.lt.s32.totalorder %s2026_s2, %s2706_s3 }
 0x129   :  { %p2031_p13 = scmp.lt.s32.totalorder %s2029_s17, %s2027_s14 }
 0x12b   :  { %s330_s21 = sshll.u32 %s2707_s9, 4  ;;  %p2032_p0 = por %p2031_p13, %p2030_p12  ;;  %s331_s21 = int_to_ptr.hbm [resolvable:$true] %s330_s21 }
 0x12d   :  { %p2033_p1 = pnand %p2032_p0, %p2028_p11 }
 0x12f   :  { %2036 = shalt.err (!%p2033_p1)
}
 0x130   :  { %311 = dma.hbm_to_vmem [thread:$0]  %s307_s7, 16, %s309_s18, [#allocation30]  }
 0x131   :  { %s2708_s13 = sld [smem:[#allocation66_spill]]  ;;  %s2227_s22 = smov [#allocation34]  }
 0x132   :  { %s332_s5 = sshll.u32 %s2227_s22, 4  ;;  %s2049_s26 = sshra.s32 %s331_s21, 4  ;;  %s333_s5 = int_to_ptr.vmem [resolvable:$true] %s332_s5  ;;  %s2050_s26 = int_to_ptr.hbm [resolvable:$true] %s2049_s26 }
 0x133   :  { %s2051_s28 = scalar_lea.hbm %s2050_s26, 1  ;;  %s2053_s23 = scalar_lea.hbm %s2707_s9, 1 }
 0x134   :  { %p2052_p2 = scmp.ne.s32.totalorder %s2050_s26, %s2051_s28  ;;  %p2054_p3 = scmp.lt.s32.totalorder %s2050_s26, %s2707_s9 }
 0x135   :  { %p2055_p4 = scmp.lt.s32.totalorder %s2053_s23, %s2051_s28 }
 0x137   :  { %s343_s30 = sshll.u32 %s2708_s13, 4  ;;  %p2056_p5 = por %p2055_p4, %p2054_p3  ;;  %s344_s30 = int_to_ptr.hbm [resolvable:$true] %s343_s30 }
 0x139   :  { %p2057_p6 = pnand %p2056_p5, %p2052_p2 }
 0x13b   :  { %2060 = shalt.err (!%p2057_p6)
}
 0x13c   :  { %335 = dma.hbm_to_vmem [thread:$0]  %s331_s21, 16, %s333_s5, [#allocation33]  }
 0x13d   :  { %s2228_s1 = smov [#allocation35]   ;;  %s2073_s20 = sshra.s32 %s344_s30, 4  ;;  %s2074_s20 = int_to_ptr.hbm [resolvable:$true] %s2073_s20 }
 0x13e   :  { %s345_s29 = sshll.u32 %s2228_s1, 4  ;;  %s2075_s27 = scalar_lea.hbm %s2074_s20, 1  ;;  %s346_s29 = int_to_ptr.vmem [resolvable:$true] %s345_s29 }
 0x13f   :  { %p2076_p7 = scmp.ne.s32.totalorder %s2074_s20, %s2075_s27  ;;  %s2077_s3 = scalar_lea.hbm %s2708_s13, 1 }
 0x140   :  { %p2078_p8 = scmp.lt.s32.totalorder %s2074_s20, %s2708_s13  ;;  %p2079_p9 = scmp.lt.s32.totalorder %s2077_s3, %s2075_s27 }
 0x142   :  { %p2080_p10 = por %p2079_p9, %p2078_p8 }
 0x144   :  { %p2081_p11 = pnand %p2080_p10, %p2076_p7 }
 0x146   :  { %2084 = shalt.err (!%p2081_p11)
}
 0x147   :  { %348 = dma.hbm_to_vmem [thread:$0]  %s344_s30, 16, %s346_s29, [#allocation36]  }
 0x148   :  { %2145 = dma.done.wait [#allocation3], 384  }
 0x149   :  { %2146 = vsyncadd [#allocation3], 4294966912 }
 0x14a   :  { %2147 = dma.done.wait [#allocation6], 640  }
 0x14b   :  { %2148 = vsyncadd [#allocation6], 4294966656 }
 0x14c   :  { %2149 = dma.done.wait [#allocation9], 32  }
 0x14d   :  { %2150 = vsyncadd [#allocation9], 4294967264 }
 0x14e   :  { %2151 = dma.done.wait [#allocation12], 32  }
 0x14f   :  { %2152 = vsyncadd [#allocation12], 4294967264 }
 0x150   :  { %2153 = dma.done.wait [#allocation15], 32  }
 0x151   :  { %2154 = vsyncadd [#allocation15], 4294967264 }
 0x152   :  { %2155 = dma.done.wait [#allocation18], 32  }
 0x153   :  { %2156 = vsyncadd [#allocation18], 4294967264 }
 0x154   :  { %2157 = dma.done.wait [#allocation21], 32  }
 0x155   :  { %2158 = vsyncadd [#allocation21], 4294967264 }
 0x156   :  { %2159 = dma.done.wait [#allocation24], 528  }
 0x157   :  { %2160 = vsyncadd [#allocation24], 4294966768 }
 0x158   :  { %2161 = dma.done.wait [#allocation27], 32  }
 0x159   :  { %2162 = vsyncadd [#allocation27], 4294967264 }
 0x15a   :  { %2163 = dma.done.wait [#allocation30], 528  }
 0x15b   :  { %2164 = vsyncadd [#allocation30], 4294966768 }
 0x15c   :  { %2165 = dma.done.wait [#allocation33], 528  }
 0x15d   :  { %2166 = vsyncadd [#allocation33], 4294966768 }
 0x15e   :  { %2167 = dma.done.wait [#allocation36], 16  }
 0x15f   :  { %2168 = vsyncadd [#allocation36], 4294967280  ;;  %s2709_s7 = sld [smem:[#allocation54_spill]]  ;;  %v449_v0 = vld [vmem:[#allocation7 + $0x8] sm:$0xff]  ;;  %v448_v1 = vld [vmem:[#allocation7] sm:$0xff]  ;;  %vm454_vm0 = vcmask 130048  }
 0x160   :  { %s2710_s10 = sld [smem:[#allocation55_spill]]  ;;  %478 = vmatpush.msra.mxu0 %v449_v0  ;;  %v1529_v10 = vld [vmem:[#allocation8] ss:$0 sm:$0xff]  ;;  %vm493_vm1 = vcmask 195584   ;;  %v2516_v16 = vld [vmem:[#allocation2 + $0x8] sm:$0xff]  ;;  %v2520_v17 = vld [vmem:[#allocation2 + $0x10] sm:$0xff] }
 0x161   :  { %v2512_v15 = vld [vmem:[#allocation2] sm:$0xff]  ;;  %s2711_s4 = sld [smem:[#allocation56_spill]]  ;;  %vm537_vm2 = vcmask 261120   ;;  %v1533_v45 = vld [vmem:[#allocation14] ss:$0 sm:$0xff]  ;;  %s1339_s18 = sshll.u32 %s2395_s24, 4  ;;  %s1340_s18 = int_to_ptr.hbm [resolvable:$true] %s1339_s18 }
 0x162   :  { %479 = vmatpush.msra.mxu0 %v448_v1  ;;  %v1530_v26 = vld [vmem:[#allocation10] ss:$0 sm:$0xff]  ;;  %v1531_v27 = vld [vmem:[#allocation11] ss:$0 sm:$0xff]  ;;  %v1532_v30 = vld [vmem:[#allocation13] ss:$0 sm:$0xff] }
 0x163   :  { %s2712_s8 = sld [smem:[#allocation58_spill]]  ;;  %v1534_v51 = vld [vmem:[#allocation16] ss:$0 sm:$0xff]  ;;  %v1535_v58 = vld [vmem:[#allocation17] ss:$0 sm:$0xff]  ;;  %s2109_s21 = sshra.s32 %s1340_s18, 4  ;;  %s2110_s21 = int_to_ptr.hbm [resolvable:$true] %s2109_s21 }
 0x164   :  { %s2713_s11 = sld [smem:[#allocation65_spill]]  ;;  %s2111_s2 = scalar_lea.hbm %s2110_s21, 24 }
 0x165   :  { %v445_v2 = vld [vmem:[%s2709_s7] sm:$0xff]  ;;  %v446_v3 = vld [vmem:[%s2709_s7 + $0x8] sm:$0xff]  ;;  %v447_v4 = vld [vmem:[%s2709_s7 + $0x10] sm:$0xff]  ;;  %s2714_s19 = sld [smem:[#allocation67_spill]]  ;;  %p2112_p12 = scmp.ne.s32.totalorder %s2110_s21, %s2111_s2 }
 0x166   :  { %1413 = vmatmul.msk.f32.vlgmr.msra.gmra.mxu0 %vm454_vm0, %v445_v2  ;;  %v532_v7 = vld [vmem:[%s2710_s10 + $0x18] sm:$0xff]  ;;  %v531_v8 = vld [vmem:[%s2710_s10 + $0x10] sm:$0xff]  ;;  %v530_v9 = vld [vmem:[%s2710_s10 + $0x8] sm:$0xff]  ;;  %s2715_s9 = sld [smem:[#allocation68_spill]]  ;;  %s2113_s14 = scalar_lea.hbm %s2395_s24, 24 }
 0x167   :  { %559 = vmatpush.msra.mxu2 %v532_v7  ;;  %v529_v18 = vld [vmem:[%s2710_s10] sm:$0xff]  ;;  %v593_v22 = vld [vmem:[%s2711_s4 + $0x18] sm:$0xff]  ;;  %v592_v23 = vld [vmem:[%s2711_s4 + $0x10] sm:$0xff]  ;;  %p2114_p13 = scmp.lt.s32.totalorder %s2110_s21, %s2395_s24  ;;  %p2115_p0 = scmp.lt.s32.totalorder %s2113_s14, %s2111_s2 }
 0x168   :  { %1463 = vmatpush.msra.mxu3 %v593_v22  ;;  %v591_v24 = vld [vmem:[%s2711_s4 + $0x8] sm:$0xff]  ;;  %v590_v25 = vld [vmem:[%s2711_s4] sm:$0xff] }
 0x169   :  { %560 = vmatpush.msra.mxu2 %v531_v8  ;;  %v679_v48 = vld [vmem:[%s2712_s8 + $0x18] sm:$0xff]  ;;  %v678_v49 = vld [vmem:[%s2712_s8 + $0x10] sm:$0xff]  ;;  %v677_v53 = vld [vmem:[%s2712_s8 + $0x8] sm:$0xff]  ;;  %p2116_p1 = por %p2115_p0, %p2114_p13 }
 0x16a   :  { %1464 = vmatpush.msra.mxu3 %v592_v23  ;;  %v676_v1 = vld [vmem:[%s2712_s8] sm:$0xff]  ;;  %v736_v8 = vld [vmem:[#allocation23] sm:$0xff] }
 0x16b   :  { %561 = vmatpush.msra.mxu2 %v530_v9  ;;  %v737_v7 = vld [vmem:[#allocation23 + $0x8] sm:$0xff]  ;;  %v1536_v9 = vld [vmem:[#allocation19] ss:$0 sm:$0xff]  ;;  %p2117_p2 = pnand %p2116_p1, %p2112_p12 }
 0x16c   :  { %1465 = vmatpush.msra.mxu3 %v591_v24 }
 0x16d   :  { %562 = vmatpush.msra.mxu2 %v529_v18 }
 0x16e   :  { %1414 = vmatmul.msk.f32.gmra.mxu0 %vm454_vm0, %v446_v3  ;;  %1466 = vmatpush.msra.mxu3 %v590_v25 }
 0x176   :  { %1415 = vmatmul.msk.f32.gmra.mxu0 %vm454_vm0, %v447_v4 }
 0x1e3   :  { %v481_v5 = vpop.f32.mrf.mxu0 }
 0x1e4   :  { %v482_v14 = vadd.f32 %v1529_v10, %v481_v5  ;;  %v739_v5 = vld [vmem:[#allocation23 + $0x18] sm:$0xff] }
 0x1e5   :  { %765 = vmatpush.msrb.mxu2 %v739_v5  ;;  %v1092_v5 = vld [vmem:[%s2714_s19] sm:$0xff] }
 0x1eb   :  { %v484_v6 = vpop.f32.mrf.mxu0 }
 0x1ec   :  { %v485_v13 = vadd.f32 %v1529_v10, %v484_v6  ;;  %v738_v6 = vld [vmem:[#allocation23 + $0x10] sm:$0xff] }
 0x1ed   :  { %766 = vmatpush.msrb.mxu2 %v738_v6 }
 0x1ef   :  { %767 = vmatpush.msrb.mxu2 %v737_v7  ;;  %v1125_v7 = vld [vmem:[%s2385_s12 + $0x18] sm:$0xff] }
 0x1f1   :  { %768 = vmatpush.msrb.mxu2 %v736_v8  ;;  %v1124_v8 = vld [vmem:[%s2385_s12 + $0x10] sm:$0xff] }
 0x1f3   :  { %v487_v11 = vpop.f32.mrf.mxu0 }
 0x1f4   :  { %v488_v12 = vadd.f32 %v1529_v10, %v487_v11  ;;  %v1537_v10 = vld [vmem:[#allocation20] ss:$0 sm:$0xff] }
 0x1f6   :  { %516 = vmatpush.msra.mxu1 %v488_v12 }
 0x1f8   :  { %517 = vmatpush.msra.mxu1 %v485_v13  ;;  %v1538_v13 = vld [vmem:[#allocation22] ss:$0 sm:$0xff] }
 0x1fa   :  { %518 = vmatpush.msra.mxu1 %v482_v14 }
 0x1fb   :  { %1416 = vmatmul.msk.f32.vlgmr.msra.gmra.mxu1 %vm493_vm1, %v2512_v15 }
 0x1fc   :  { %619 = vmatpush.msrb.mxu1 %v593_v22 }
 0x1fe   :  { %620 = vmatpush.msrb.mxu1 %v592_v23 }
 0x200   :  { %621 = vmatpush.msrb.mxu1 %v591_v24 }
 0x202   :  { %622 = vmatpush.msrb.mxu1 %v590_v25 }
 0x203   :  { %1417 = vmatmul.msk.f32.gmra.mxu1 %vm493_vm1, %v2516_v16 }
 0x204   :  { %705 = vmatpush.msra.mxu1 %v679_v48  ;;  %v840_v48 = vld [vmem:[#allocation32 + $0x8] sm:$0xff] }
 0x206   :  { %706 = vmatpush.msra.mxu1 %v678_v49  ;;  %v839_v49 = vld [vmem:[#allocation32] sm:$0xff] }
 0x208   :  { %707 = vmatpush.msra.mxu1 %v677_v53  ;;  %v1542_v53 = vld [vmem:[#allocation31] ss:$0 sm:$0xff] }
 0x20a   :  { %708 = vmatpush.msra.mxu1 %v676_v1  ;;  %v1095_v1 = vld [vmem:[%s2714_s19 + $0x18] sm:$0xff] }
 0x20b   :  { %1418 = vmatmul.msk.f32.gmra.mxu1 %vm493_vm1, %v2520_v17 }
 0x278   :  { %v520_v19 = vpop.f32.mrf.mxu1 }
 0x279   :  { %1419 = vmatmul.msk.f32.vlgmr.msra.gmra.mxu2 %vm537_vm2, %v520_v19 }
 0x280   :  { %v523_v20 = vpop.f32.mrf.mxu1 }
 0x281   :  { %1420 = vmatmul.msk.f32.gmra.mxu2 %vm537_vm2, %v523_v20 }
 0x288   :  { %v526_v21 = vpop.f32.mrf.mxu1 }
 0x289   :  { %1421 = vmatmul.msk.f32.gmra.mxu2 %vm537_vm2, %v526_v21 }
 0x2fc   :  { %v564_v28 = vpop.f32.mrf.mxu2 }
 0x2fd   :  { %v565_v29 = vadd.f32 %v1530_v26, %v564_v28  ;;  %v795_v28 = vld [vmem:[#allocation29 + $0x10] sm:$0xff] }
 0x2ff   :  { %v577_v31 = vmul.f32 %v1531_v27, %v565_v29  ;;  %v794_v29 = vld [vmem:[#allocation29 + $0x8] sm:$0xff] }
 0x301   :  { %v584_v32 = vadd.f32 %v1532_v30, %v577_v31  ;;  %v842_v31 = vld [vmem:[#allocation32 + $0x18] sm:$0xff] }
 0x303   :  { %v587_v33 = vmax.f32 %v584_v32, 0.0  ;;  %v841_v32 = vld [vmem:[#allocation32 + $0x10] sm:$0xff] }
 0x304   :  { %v567_v34 = vpop.f32.mrf.mxu2 }
 0x305   :  { %v568_v35 = vadd.f32 %v1530_v26, %v567_v34  ;;  %1422 = vmatmul.msk.f32.vlgmr.msrb.gmra.mxu1 %vm537_vm2, %v587_v33  ;;  %v1539_v33 = vld [vmem:[#allocation25] ss:$0 sm:$0xff]  ;;  %v1540_v34 = vld [vmem:[#allocation26] ss:$0 sm:$0xff] }
 0x307   :  { %v578_v36 = vmul.f32 %v1531_v27, %v568_v35 }
 0x309   :  { %v585_v37 = vadd.f32 %v1532_v30, %v578_v36 }
 0x30b   :  { %v588_v38 = vmax.f32 %v585_v37, 0.0  ;;  %v1541_v37 = vld [vmem:[#allocation28] ss:$0 sm:$0xff] }
 0x30c   :  { %v570_v39 = vpop.f32.mrf.mxu2 }
 0x30d   :  { %v571_v40 = vadd.f32 %v1530_v26, %v570_v39  ;;  %1423 = vmatmul.msk.f32.vlgmr.msra.gmra.mxu3 %vm537_vm2, %v588_v38 }
 0x30f   :  { %v579_v41 = vmul.f32 %v1531_v27, %v571_v40  ;;  %v796_v27 = vld [vmem:[#allocation29 + $0x18] sm:$0xff] }
 0x310   :  { %822 = vmatpush.msrb.mxu3 %v796_v27 }
 0x311   :  { %v586_v42 = vadd.f32 %v1532_v30, %v579_v41  ;;  %v793_v30 = vld [vmem:[#allocation29] sm:$0xff] }
 0x312   :  { %823 = vmatpush.msrb.mxu3 %v795_v28 }
 0x313   :  { %v589_v43 = vmax.f32 %v586_v42, 0.0 }
 0x314   :  { %824 = vmatpush.msrb.mxu3 %v794_v29 }
 0x315   :  { %1424 = vmatmul.msk.f32.gmra.mxu3 %vm537_vm2, %v589_v43 }
 0x316   :  { %825 = vmatpush.msrb.mxu3 %v793_v30 }
 0x382   :  { %v624_v46 = vpop.f32.mrf.mxu1 }
 0x383   :  { %v625_v50 = vadd.f32 %v1533_v45, %v624_v46 }
 0x385   :  { %v637_v56 = vmul.f32 %v1534_v51, %v625_v50  ;;  %v881_v50 = vld [vmem:[%s2713_s11 + $0x18] sm:$0xff] }
 0x386   :  { %903 = vmatpush.msrb.mxu1 %v881_v50 }
 0x387   :  { %v644_v62 = vadd.f32 %v1535_v58, %v637_v56 }
 0x389   :  { %v647_v0 = vmax.f32 %v644_v62, 0.0 }
 0x390   :  { %v627_v44 = vpop.f32.mrf.mxu3 }
 0x391   :  { %v628_v47 = vadd.f32 %v1533_v45, %v627_v44 }
 0x393   :  { %v638_v54 = vmul.f32 %v1534_v51, %v628_v47 }
 0x395   :  { %v645_v60 = vadd.f32 %v1535_v58, %v638_v54 }
 0x397   :  { %v648_v63 = vmax.f32 %v645_v60, 0.0  ;;  %v878_v60 = vld [vmem:[%s2713_s11] sm:$0xff] }
 0x398   :  { %v630_v52 = vpop.f32.mrf.mxu3 }
 0x399   :  { %v631_v55 = vadd.f32 %v1533_v45, %v630_v52  ;;  %v879_v52 = vld [vmem:[%s2713_s11 + $0x8] sm:$0xff] }
 0x39b   :  { %v639_v57 = vmul.f32 %v1534_v51, %v631_v55  ;;  %v880_v51 = vld [vmem:[%s2713_s11 + $0x10] sm:$0xff] }
 0x39c   :  { %904 = vmatpush.msrb.mxu1 %v880_v51 }
 0x39d   :  { %v646_v59 = vadd.f32 %v1535_v58, %v639_v57 }
 0x39e   :  { %905 = vmatpush.msrb.mxu1 %v879_v52 }
 0x39f   :  { %v649_v61 = vmax.f32 %v646_v59, 0.0 }
 0x3a0   :  { %906 = vmatpush.msrb.mxu1 %v878_v60 }
 0x3a1   :  { %663 = vmatpush.msrb.mxu0 %v649_v61 }
 0x3a3   :  { %664 = vmatpush.msrb.mxu0 %v648_v63 }
 0x3a5   :  { %665 = vmatpush.msrb.mxu0 %v647_v0  ;;  %v2229_v0 = vmov 0  }
 0x3a6   :  { %1425 = vmatmul.msk.f32.vlgmr.msrb.gmra.mxu0 %vm493_vm1, %v2512_v15  ;;  %1526 = vset.pattern.permute.xlu0 %v2229_v0 }
 0x3a7   :  { %864 = vmatpush.msra.mxu0 %v842_v31  ;;  %1527 = vset.pattern.permute.xlu1 %v2229_v0 }
 0x3a8   :  { %1528 = vset.pattern.permute.xlu2 %v2229_v0 }
 0x3a9   :  { %865 = vmatpush.msra.mxu0 %v841_v32  ;;  %v2593_v32 = vld [vmem:[#allocation5 + $0x8] sm:$0xff] }
 0x3aa   :  { %vm970_vm6 = vcmp.gt.f32.partialorder %v2593_v32, 0.0 }
 0x3ab   :  { %866 = vmatpush.msra.mxu0 %v840_v48 }
 0x3ad   :  { %867 = vmatpush.msra.mxu0 %v839_v49 }
 0x3ae   :  { %1426 = vmatmul.msk.f32.gmra.mxu0 %vm493_vm1, %v2516_v16 }
 0x3af   :  { %1147 = vmatpush.msrb.mxu0 %v1125_v7 }
 0x3b1   :  { %1148 = vmatpush.msrb.mxu0 %v1124_v8 }
 0x3b6   :  { %1427 = vmatmul.msk.f32.gmra.mxu0 %vm493_vm1, %v2520_v17 }
 0x423   :  { %v667_v2 = vpop.f32.mrf.mxu0 }
 0x424   :  { %1428 = vmatmul.msk.f32.vlgmr.msra.gmra.mxu1 %vm537_vm2, %v667_v2  ;;  %v917_v2 = vld [vmem:[#allocation34] sm:$0x1] }
 0x42b   :  { %v670_v3 = vpop.f32.mrf.mxu0 }
 0x42c   :  { %1429 = vmatmul.msk.f32.gmra.mxu1 %vm537_vm2, %v670_v3  ;;  %v1094_v3 = vld [vmem:[%s2714_s19 + $0x10] sm:$0xff] }
 0x433   :  { %v673_v4 = vpop.f32.mrf.mxu0 }
 0x434   :  { %1430 = vmatmul.msk.f32.gmra.mxu1 %vm537_vm2, %v673_v4  ;;  %v1093_v4 = vld [vmem:[%s2714_s19 + $0x8] sm:$0xff] }
 0x4a1   :  { %v710_v11 = vpop.f32.mrf.mxu1 }
 0x4a2   :  { %v711_v12 = vadd.f32 %v1536_v9, %v710_v11  ;;  %v1122_v11 = vld [vmem:[%s2385_s12] sm:$0xff] }
 0x4a4   :  { %v723_v14 = vmul.f32 %v1537_v10, %v711_v12 }
 0x4a6   :  { %v730_v15 = vadd.f32 %v1538_v13, %v723_v14 }
 0x4a8   :  { %v733_v16 = vmax.f32 %v730_v15, 0.0 }
 0x4a9   :  { %v713_v17 = vpop.f32.mrf.mxu1 }
 0x4aa   :  { %v714_v18 = vadd.f32 %v1536_v9, %v713_v17  ;;  %1431 = vmatmul.msk.f32.vlgmr.msrb.gmra.mxu2 %vm537_vm2, %v733_v16  ;;  %v1161_v17 = vld [vmem:[%s2715_s9] sm:$0x1] }
 0x4ac   :  { %v724_v19 = vmul.f32 %v1537_v10, %v714_v18 }
 0x4ae   :  { %v731_v20 = vadd.f32 %v1538_v13, %v724_v19 }
 0x4b0   :  { %v734_v21 = vmax.f32 %v731_v20, 0.0  ;;  %v2587_v20 = vld [vmem:[#allocation5] sm:$0xff] }
 0x4b1   :  { %v716_v22 = vpop.f32.mrf.mxu1  ;;  %vm969_vm4 = vcmp.gt.f32.partialorder %v2587_v20, 0.0 }
 0x4b2   :  { %v717_v23 = vadd.f32 %v1536_v9, %v716_v22  ;;  %1432 = vmatmul.msk.f32.gmra.mxu2 %vm537_vm2, %v734_v21  ;;  %v1123_v9 = vld [vmem:[%s2385_s12 + $0x8] sm:$0xff]  ;;  %s2230_s12 = smov [#allocation37]  }
 0x4b3   :  { %1149 = vmatpush.msrb.mxu0 %v1123_v9  ;;  %s1337_s0 = sshll.u32 %s2230_s12, 4  ;;  %s1338_s0 = int_to_ptr.vmem [resolvable:$true] %s1337_s0 }
 0x4b4   :  { %v725_v24 = vmul.f32 %v1537_v10, %v717_v23 }
 0x4b5   :  { %1150 = vmatpush.msrb.mxu0 %v1122_v11 }
 0x4b6   :  { %v732_v25 = vadd.f32 %v1538_v13, %v725_v24 }
 0x4b8   :  { %v735_v26 = vmax.f32 %v732_v25, 0.0 }
 0x4ba   :  { %1433 = vmatmul.msk.f32.gmra.mxu2 %vm537_vm2, %v735_v26 }
 0x52d   :  { %v770_v35 = vpop.f32.mrf.mxu2 }
 0x52e   :  { %v771_v36 = vadd.f32 %v1539_v33, %v770_v35 }
 0x530   :  { %v783_v38 = vmul.f32 %v1540_v34, %v771_v36 }
 0x532   :  { %v790_v39 = vadd.f32 %v1541_v37, %v783_v38 }
 0x534   :  { %1434 = vmatmul.msk.f32.vlgmr.msrb.gmra.mxu3 %vm537_vm2, %v790_v39  ;;  %v2599_v39 = vld [vmem:[#allocation5 + $0x10] sm:$0xff] }
 0x535   :  { %v773_v40 = vpop.f32.mrf.mxu2  ;;  %vm971_vm8 = vcmp.gt.f32.partialorder %v2599_v39, 0.0 }
 0x536   :  { %v774_v41 = vadd.f32 %v1539_v33, %v773_v40 }
 0x538   :  { %v784_v42 = vmul.f32 %v1540_v34, %v774_v41 }
 0x53a   :  { %v791_v43 = vadd.f32 %v1541_v37, %v784_v42 }
 0x53c   :  { %1435 = vmatmul.msk.f32.gmra.mxu3 %vm537_vm2, %v791_v43 }
 0x53d   :  { %v776_v44 = vpop.f32.mrf.mxu2 }
 0x53e   :  { %v777_v45 = vadd.f32 %v1539_v33, %v776_v44 }
 0x540   :  { %v785_v46 = vmul.f32 %v1540_v34, %v777_v45 }
 0x542   :  { %v792_v47 = vadd.f32 %v1541_v37, %v785_v46 }
 0x544   :  { %1436 = vmatmul.msk.f32.gmra.mxu3 %vm537_vm2, %v792_v47 }
 0x5b7   :  { %v827_v54 = vpop.f32.mrf.mxu3 }
 0x5b8   :  { %v828_v55 = vadd.f32 %v1542_v53, %v827_v54 }
 0x5ba   :  { %1437 = vmatmul.msk.f32.vlgmr.msra.gmra.mxu0 %vm537_vm2, %v828_v55 }
 0x5bf   :  { %v830_v56 = vpop.f32.mrf.mxu3 }
 0x5c0   :  { %v831_v57 = vadd.f32 %v1542_v53, %v830_v56 }
 0x5c2   :  { %1438 = vmatmul.msk.f32.gmra.mxu0 %vm537_vm2, %v831_v57 }
 0x5c7   :  { %v833_v58 = vpop.f32.mrf.mxu3 }
 0x5c8   :  { %v834_v59 = vadd.f32 %v1542_v53, %v833_v58 }
 0x5ca   :  { %1439 = vmatmul.msk.f32.gmra.mxu0 %vm537_vm2, %v834_v59 }
 0x637   :  { %v869_v61 = vpop.f32.mrf.mxu0 }
 0x638   :  { %1440 = vmatmul.msk.f32.vlgmr.msrb.gmra.mxu1 %vm537_vm2, %v869_v61 }
 0x63f   :  { %v872_v62 = vpop.f32.mrf.mxu0 }
 0x640   :  { %1441 = vmatmul.msk.f32.gmra.mxu1 %vm537_vm2, %v872_v62 }
 0x647   :  { %v875_v63 = vpop.f32.mrf.mxu0 }
 0x648   :  { %1442 = vmatmul.msk.f32.gmra.mxu1 %vm537_vm2, %v875_v63  ;;  %1443 = vmatpush.xpose.msk.msra.mxu2 %vm537_vm2, %v875_v63 }
 0x649   :  { %1076 = vmatpush.msra.mxu3 %v875_v63 }
 0x64b   :  { %1077 = vmatpush.msra.mxu3 %v872_v62 }
 0x64c   :  { %1444 = vmatpush.xpose.msk.msra.mxu2 %vm537_vm2, %v872_v62 }
 0x64d   :  { %1078 = vmatpush.msra.mxu3 %v869_v61 }
 0x650   :  { %1445 = vmatpush.xpose.msk.msra.mxu2 %vm537_vm2, %v869_v61 }
 0x653   :  { %1446 = vmatmul.msk.f32.vlgmr.msra.gmra.mxu2 %vm537_vm2, %v917_v2 }
 0x654   :  { %1108 = vmatpush.msrb.mxu2 %v1095_v1 }
 0x656   :  { %1109 = vmatpush.msrb.mxu2 %v1094_v3 }
 0x658   :  { %1110 = vmatpush.msrb.mxu2 %v1093_v4 }
 0x65a   :  { %1111 = vmatpush.msrb.mxu2 %v1092_v5 }
 0x65b   :  { %1450 = vmatmul.msk.f32.vlgmr.msrb.gmra.mxu2 %vm537_vm2, %v828_v55 }
 0x663   :  { %1451 = vmatmul.msk.f32.gmra.mxu2 %vm537_vm2, %v831_v57 }
 0x66b   :  { %1452 = vmatmul.msk.f32.gmra.mxu2 %vm537_vm2, %v834_v59 }
 0x6b5   :  { %v908_v6 = vpop.f32.mrf.mxu1 }
 0x6b6   :  { %943 = vperm.xlu0 %1526, %v908_v6  }
 0x6bd   :  { %v911_v10 = vpop.f32.mrf.mxu1 }
 0x6be   :  { %948 = vperm.xlu0 %1526, %v911_v10  }
 0x6c5   :  { %v914_v12 = vpop.f32.mrf.mxu1 }
 0x6c6   :  { %953 = vperm.xlu1 %1527, %v914_v12  }
 0x6d6   :  { %v938_v13 = vpop.f32.mrf.mxu2 }
 0x6d7   :  { %v956_v18 = vperm.slane %v938_v13, 0 }
 0x6de   :  { %v1113_v14 = vpop.f32.mrf.mxu2 }
 0x6df   :  { %1453 = vmatmul.msk.f32.vlgmr.msrb.gmra.mxu0 %vm537_vm2, %v1113_v14 }
 0x6e6   :  { %v1116_v15 = vpop.f32.mrf.mxu2 }
 0x6e7   :  { %1454 = vmatmul.msk.f32.gmra.mxu0 %vm537_vm2, %v1116_v15 }
 0x6ee   :  { %v1119_v16 = vpop.f32.mrf.mxu2 }
 0x6ef   :  { %1455 = vmatmul.msk.f32.gmra.mxu0 %vm537_vm2, %v1119_v16  ;;  %1456 = vmatpush.xpose.msk.msra.mxu1 %vm537_vm2, %v1119_v16 }
 0x6f0   :  { %1317 = vmatpush.msrb.mxu3 %v1119_v16 }
 0x6f2   :  { %1318 = vmatpush.msrb.mxu3 %v1116_v15 }
 0x6f3   :  { %1457 = vmatpush.xpose.msk.msra.mxu1 %vm537_vm2, %v1116_v15 }
 0x6f4   :  { %1319 = vmatpush.msrb.mxu3 %v1113_v14 }
 0x6f7   :  { %1458 = vmatpush.xpose.msk.msra.mxu1 %vm537_vm2, %v1113_v14 }
 0x6fa   :  { %1459 = vmatmul.msk.f32.vlgmr.msra.gmra.mxu1 %vm537_vm2, %v1161_v17 }
 0x728   :  { %v944_v19 = vpop.permute.xlu0 %943 }
 0x729   :  { %v957_v21 = vadd.f32 %v956_v18, %v944_v19 }
 0x72b   :  { %v963_v22 = vmul.f32 0.2, %v957_v21  ;;  %vm960_vm3 = vcmp.gt.f32.partialorder %v957_v21, 0.0 }
 0x72d   :  { %v966_v23 = vsel %vm960_vm3, %v957_v21, %v963_v22 }
 0x72e   :  { %v972_v24 = vsel %vm969_vm4, %v966_v23, -1e+09 }
 0x72f   :  { %v975_v25 = vsel %vm493_vm1, %v972_v24, -inf }
 0x730   :  { %976 = vmax.xlane.f32.xlu0 %v975_v25  ;;  %v949_v29 = vpop.permute.xlu0 %948 }
 0x731   :  { %v958_v30 = vadd.f32 %v956_v18, %v949_v29 }
 0x733   :  { %v964_v31 = vmul.f32 0.2, %v958_v30  ;;  %vm961_vm5 = vcmp.gt.f32.partialorder %v958_v30, 0.0 }
 0x735   :  { %v967_v33 = vsel %vm961_vm5, %v958_v30, %v964_v31 }
 0x736   :  { %v973_v34 = vsel %vm970_vm6, %v967_v33, -1e+09 }
 0x737   :  { %v978_v36 = vsel %vm493_vm1, %v973_v34, -inf }
 0x738   :  { %v954_v35 = vpop.permute.xlu1 %953 }
 0x739   :  { %v959_v37 = vadd.f32 %v956_v18, %v954_v35 }
 0x73b   :  { %v965_v38 = vmul.f32 0.2, %v959_v37  ;;  %vm962_vm7 = vcmp.gt.f32.partialorder %v959_v37, 0.0 }
 0x73d   :  { %v968_v40 = vsel %vm962_vm7, %v959_v37, %v965_v38 }
 0x73e   :  { %v974_v41 = vsel %vm971_vm8, %v968_v40, -1e+09 }
 0x73f   :  { %v981_v42 = vsel %vm493_vm1, %v974_v41, -inf }
 0x75c   :  { %v1152_v26 = vpop.f32.mrf.mxu0 }
 0x75d   :  { %1187 = vperm.xlu1 %1527, %v1152_v26  }
 0x764   :  { %v1155_v27 = vpop.f32.mrf.mxu0 }
 0x765   :  { %1192 = vperm.xlu2 %1528, %v1155_v27  }
 0x76c   :  { %v1158_v28 = vpop.f32.mrf.mxu0 }
 0x76d   :  { %1197 = vperm.xlu2 %1528, %v1158_v28  }
 0x777   :  { %v1182_v43 = vpop.f32.mrf.mxu1 }
 0x778   :  { %v1200_v44 = vperm.slane %v1182_v43, 0 }
 0x787   :  { %979 = vmax.xlane.f32.xlu1 %v978_v36 }
 0x796   :  { %982 = vmax.xlane.f32.xlu2 %v981_v42 }
 0x7a3   :  { %v977_v50 = vpop.xlane.xlu0 %976 }
 0x7a4   :  { %v984_v54 = vsub.f32 %v972_v24, %v977_v50 }
 0x7a6   :  { %v987_v57 = vmul.f32 1.442695, %v984_v54 }
 0x7a8   :  { %1545 = vpow2.f32 %v987_v57 }
 0x7ae   :  { %v1546_v2 = vpop.eup %1545 }
 0x7af   :  { %v993_v3 = vmul.f32 %v1546_v2, %v2587_v20 }
 0x7b1   :  { %v996_v4 = vsel %vm493_vm1, %v993_v3, 0.0 }
 0x7bf   :  { %v1193_v45 = vpop.permute.xlu2 %1192 }
 0x7c0   :  { %v1202_v46 = vadd.f32 %v1200_v44, %v1193_v45 }
 0x7c2   :  { %v1208_v47 = vmul.f32 0.2, %v1202_v46  ;;  %vm1205_vm9 = vcmp.gt.f32.partialorder %v1202_v46, 0.0 }
 0x7c4   :  { %v1211_v48 = vsel %vm1205_vm9, %v1202_v46, %v1208_v47 }
 0x7c5   :  { %v1214_v49 = vsel %vm970_vm6, %v1211_v48, -1e+09 }
 0x7c6   :  { %v1219_v51 = vsel %vm493_vm1, %v1214_v49, -inf }
 0x7c7   :  { %v1198_v52 = vpop.permute.xlu2 %1197  ;;  %1220 = vmax.xlane.f32.xlu0 %v1219_v51 }
 0x7c8   :  { %v1203_v53 = vadd.f32 %v1200_v44, %v1198_v52 }
 0x7ca   :  { %v1209_v55 = vmul.f32 0.2, %v1203_v53  ;;  %vm1206_vm10 = vcmp.gt.f32.partialorder %v1203_v53, 0.0 }
 0x7cc   :  { %v1212_v56 = vsel %vm1206_vm10, %v1203_v53, %v1209_v55 }
 0x7cd   :  { %v1215_v58 = vsel %vm971_vm8, %v1212_v56, -1e+09 }
 0x7ce   :  { %v1222_v59 = vsel %vm493_vm1, %v1215_v58, -inf }
 0x7cf   :  { %v1188_v60 = vpop.permute.xlu1 %1187  ;;  %1223 = vmax.xlane.f32.xlu1 %v1222_v59 }
 0x7d0   :  { %v1201_v61 = vadd.f32 %v1200_v44, %v1188_v60 }
 0x7d2   :  { %v1207_v62 = vmul.f32 0.2, %v1201_v61  ;;  %vm1204_vm11 = vcmp.gt.f32.partialorder %v1201_v61, 0.0 }
 0x7d4   :  { %v1210_v63 = vsel %vm1204_vm11, %v1201_v61, %v1207_v62 }
 0x7d5   :  { %v1213_v0 = vsel %vm969_vm4, %v1210_v63, -1e+09 }
 0x7d6   :  { %v1216_v1 = vsel %vm493_vm1, %v1213_v0, -inf }
 0x7d7   :  { %1217 = vmax.xlane.f32.xlu2 %v1216_v1 }
 0x7df   :  { %997 = vadd.xlane.f32.xlu2 %v996_v4 }
 0x7fa   :  { %v980_v5 = vpop.xlane.xlu1 %979 }
 0x7fb   :  { %v985_v6 = vsub.f32 %v973_v34, %v980_v5 }
 0x7fd   :  { %v989_v7 = vmul.f32 1.442695, %v985_v6 }
 0x7ff   :  { %1547 = vpow2.f32 %v989_v7 }
 0x805   :  { %v1548_v8 = vpop.eup %1547 }
 0x806   :  { %v2617_v9 = vmul.f32 %v1548_v8, %v2593_v32 }
 0x808   :  { %v999_v10 = vsel %vm493_vm1, %v2617_v9, 0.0 }
 0x809   :  { %v983_v11 = vpop.xlane.xlu2 %982  ;;  %1000 = vadd.xlane.f32.xlu0 %v999_v10 }
 0x80a   :  { %v986_v12 = vsub.f32 %v974_v41, %v983_v11 }
 0x80c   :  { %v991_v13 = vmul.f32 1.442695, %v986_v12 }
 0x80e   :  { %1549 = vpow2.f32 %v991_v13 }
 0x814   :  { %v1550_v14 = vpop.eup %1549 }
 0x815   :  { %v2622_v15 = vmul.f32 %v1550_v14, %v2599_v39 }
 0x817   :  { %v1002_v16 = vsel %vm493_vm1, %v2622_v15, 0.0 }
 0x818   :  { %1003 = vadd.xlane.f32.xlu1 %v1002_v16 }
 0x83a   :  { %v1221_v17 = vpop.xlane.xlu0 %1220 }
 0x83b   :  { %v1226_v18 = vsub.f32 %v1214_v49, %v1221_v17 }
 0x83d   :  { %v1230_v19 = vmul.f32 1.442695, %v1226_v18 }
 0x83f   :  { %1551 = vpow2.f32 %v1230_v19 }
 0x842   :  { %v1224_v21 = vpop.xlane.xlu1 %1223 }
 0x843   :  { %v1227_v22 = vsub.f32 %v1215_v58, %v1224_v21 }
 0x845   :  { %v1552_v23 = vpop.eup %1551  ;;  %v1232_v24 = vmul.f32 1.442695, %v1227_v22 }
 0x846   :  { %v2627_v25 = vmul.f32 %v1552_v23, %v2593_v32 }
 0x847   :  { %1553 = vpow2.f32 %v1232_v24 }
 0x848   :  { %v1240_v26 = vsel %vm493_vm1, %v2627_v25, 0.0 }
 0x849   :  { %1241 = vadd.xlane.f32.xlu0 %v1240_v26 }
 0x84a   :  { %v1218_v27 = vpop.xlane.xlu2 %1217 }
 0x84b   :  { %v1225_v28 = vsub.f32 %v1213_v0, %v1218_v27 }
 0x84d   :  { %v1554_v29 = vpop.eup %1553  ;;  %v1228_v30 = vmul.f32 1.442695, %v1225_v28 }
 0x84e   :  { %v2632_v31 = vmul.f32 %v1554_v29, %v2599_v39 }
 0x84f   :  { %1555 = vpow2.f32 %v1228_v30 }
 0x850   :  { %v1243_v33 = vsel %vm493_vm1, %v2632_v31, 0.0 }
 0x851   :  { %1244 = vadd.xlane.f32.xlu1 %v1243_v33 }
 0x852   :  { %v998_v34 = vpop.xlane.xlu2 %997 }
 0x853   :  { %1557 = vrcp.f32 %v998_v34  ;;  %v1016_v39 = vand.u32 2147483648, %v998_v34  ;;  %v1014_v42 = vand.u32 2147483647, %v998_v34  ;;  %vm1010_vm13 = vweird.f32 %v998_v34 }
 0x855   :  { %v1556_v32 = vpop.eup %1555  ;;  %v1017_v44 = vor.u32 1.1754944e-38, %v1016_v39  ;;  %vm1015_vm15 = vcmp.eq.f32.partialorder %v1014_v42, 8.507059e+37 }
 0x856   :  { %v2637_v35 = vmul.f32 %v1556_v32, %v2587_v20 }
 0x858   :  { %v1237_v36 = vsel %vm493_vm1, %v2637_v35, 0.0 }
 0x859   :  { %v1558_v37 = vpop.eup %1557  ;;  %1238 = vadd.xlane.f32.xlu2 %v1237_v36 }
 0x85a   :  { %v1006_v38 = vmul.f32 %v1558_v37, %v998_v34  ;;  %vm1011_vm12 = vweird.f32 %v1558_v37 }
 0x85b   :  { %vm1012_vm14 = vmor %vm1010_vm13, %vm1011_vm12 }
 0x85c   :  { %v1007_v40 = vsub.f32 1.0, %v1006_v38 }
 0x85e   :  { %v1008_v41 = vmul.f32 %v1558_v37, %v1007_v40 }
 0x860   :  { %v1009_v43 = vadd.f32 %v1558_v37, %v1008_v41 }
 0x862   :  { %v1013_v45 = vsel %vm1012_vm14, %v1558_v37, %v1009_v43  ;;  %v1543_v43 = vld [vmem:[#allocation35] ss:$0 sm:$0xff] }
 0x863   :  { %v1018_v46 = vsel %vm1015_vm15, %v1017_v44, %v1013_v45 }
 0x864   :  { %v1047_v20 = vmul.f32 %v1018_v46, %v993_v3 }
 0x866   :  { %1447 = vmatmul.msk.f32.vlgmr.msra.gmra.mxu3 %vm493_vm1, %v1047_v20 }
 0x87c   :  { %v1001_v47 = vpop.xlane.xlu0 %1000 }
 0x87d   :  { %1559 = vrcp.f32 %v1001_v47  ;;  %v1030_v51 = vand.u32 2147483648, %v1001_v47  ;;  %v1028_v53 = vand.u32 2147483647, %v1001_v47  ;;  %vm1024_vm3 = vweird.f32 %v1001_v47 }
 0x87f   :  { %v1031_v55 = vor.u32 1.1754944e-38, %v1030_v51  ;;  %vm1029_vm5 = vcmp.eq.f32.partialorder %v1028_v53, 8.507059e+37 }
 0x883   :  { %v1560_v48 = vpop.eup %1559 }
 0x884   :  { %v1020_v49 = vmul.f32 %v1560_v48, %v1001_v47  ;;  %vm1025_vm0 = vweird.f32 %v1560_v48 }
 0x885   :  { %vm1026_vm4 = vmor %vm1024_vm3, %vm1025_vm0 }
 0x886   :  { %v1021_v50 = vsub.f32 1.0, %v1020_v49 }
 0x888   :  { %v1022_v52 = vmul.f32 %v1560_v48, %v1021_v50 }
 0x88a   :  { %v1023_v54 = vadd.f32 %v1560_v48, %v1022_v52 }
 0x88b   :  { %v1004_v56 = vpop.xlane.xlu1 %1003 }
 0x88c   :  { %1561 = vrcp.f32 %v1004_v56  ;;  %v1027_v57 = vsel %vm1026_vm4, %v1560_v48, %v1023_v54  ;;  %v1044_v63 = vand.u32 2147483648, %v1004_v56  ;;  %v1042_v1 = vand.u32 2147483647, %v1004_v56 }
 0x88d   :  { %v1032_v58 = vsel %vm1029_vm5, %v1031_v55, %v1027_v57  ;;  %vm1038_vm7 = vweird.f32 %v1004_v56 }
 0x88e   :  { %v1048_v59 = vmul.f32 %v1032_v58, %v2617_v9  ;;  %v1045_v3 = vor.u32 1.1754944e-38, %v1044_v63  ;;  %vm1043_vm9 = vcmp.eq.f32.partialorder %v1042_v1, 8.507059e+37 }
 0x890   :  { %1448 = vmatmul.msk.f32.gmra.mxu3 %vm493_vm1, %v1048_v59 }
 0x892   :  { %v1562_v60 = vpop.eup %1561 }
 0x893   :  { %v1034_v61 = vmul.f32 %v1562_v60, %v1004_v56  ;;  %vm1039_vm6 = vweird.f32 %v1562_v60 }
 0x894   :  { %vm1040_vm8 = vmor %vm1038_vm7, %vm1039_vm6 }
 0x895   :  { %v1035_v62 = vsub.f32 1.0, %v1034_v61 }
 0x897   :  { %v1036_v0 = vmul.f32 %v1562_v60, %v1035_v62 }
 0x899   :  { %v1037_v2 = vadd.f32 %v1562_v60, %v1036_v0 }
 0x89b   :  { %v1041_v4 = vsel %vm1040_vm8, %v1562_v60, %v1037_v2 }
 0x89c   :  { %v1046_v5 = vsel %vm1043_vm9, %v1045_v3, %v1041_v4 }
 0x89d   :  { %v1049_v6 = vmul.f32 %v1046_v5, %v2622_v15 }
 0x89f   :  { %1449 = vmatmul.msk.f32.gmra.mxu3 %vm493_vm1, %v1049_v6 }
 0x8bc   :  { %v1242_v7 = vpop.xlane.xlu0 %1241 }
 0x8bd   :  { %1563 = vrcp.f32 %v1242_v7  ;;  %v1271_v29 = vand.u32 2147483648, %v1242_v7  ;;  %vm1265_vm15 = vweird.f32 %v1242_v7  ;;  %v1269_v33 = vand.u32 2147483647, %v1242_v7 }
 0x8bf   :  { %v1272_v37 = vor.u32 1.1754944e-38, %v1271_v29  ;;  %vm1270_vm3 = vcmp.eq.f32.partialorder %v1269_v33, 8.507059e+37 }
 0x8c3   :  { %v1564_v8 = vpop.eup %1563 }
 0x8c4   :  { %v1245_v9 = vpop.xlane.xlu1 %1244  ;;  %v1261_v11 = vmul.f32 %v1564_v8, %v1242_v7  ;;  %vm1266_vm12 = vweird.f32 %v1564_v8 }
 0x8c5   :  { %vm1267_vm0 = vmor %vm1265_vm15, %vm1266_vm12  ;;  %v1285_v39 = vand.u32 2147483648, %v1245_v9  ;;  %vm1279_vm5 = vweird.f32 %v1245_v9  ;;  %v1283_v41 = vand.u32 2147483647, %v1245_v9 }
 0x8c6   :  { %v1262_v13 = vsub.f32 1.0, %v1261_v11 }
 0x8c7   :  { %v1286_v44 = vor.u32 1.1754944e-38, %v1285_v39  ;;  %vm1284_vm7 = vcmp.eq.f32.partialorder %v1283_v41, 8.507059e+37 }
 0x8c8   :  { %v1263_v18 = vmul.f32 %v1564_v8, %v1262_v13 }
 0x8ca   :  { %v1264_v26 = vadd.f32 %v1564_v8, %v1263_v18 }
 0x8cc   :  { %v1239_v10 = vpop.xlane.xlu2 %1238  ;;  %v1268_v36 = vsel %vm1267_vm0, %v1564_v8, %v1264_v26 }
 0x8cd   :  { %1565 = vrcp.f32 %v1239_v10  ;;  %v1257_v19 = vand.u32 2147483648, %v1239_v10  ;;  %v1255_v15 = vand.u32 2147483647, %v1239_v10  ;;  %vm1251_vm11 = vweird.f32 %v1239_v10 }
 0x8ce   :  { %1567 = vrcp.f32 %v1245_v9  ;;  %v1273_v38 = vsel %vm1270_vm3, %v1272_v37, %v1268_v36 }
 0x8cf   :  { %v1258_v24 = vor.u32 1.1754944e-38, %v1257_v19  ;;  %vm1256_vm14 = vcmp.eq.f32.partialorder %v1255_v15, 8.507059e+37  ;;  %v1289_v42 = vmul.f32 %v1273_v38, %v2627_v25 }
 0x8d3   :  { %v1566_v12 = vpop.eup %1565 }
 0x8d4   :  { %v1247_v14 = vmul.f32 %v1566_v12, %v1239_v10  ;;  %v1568_v16 = vpop.eup %1567  ;;  %vm1252_vm10 = vweird.f32 %v1566_v12 }
 0x8d5   :  { %v1275_v21 = vmul.f32 %v1568_v16, %v1245_v9  ;;  %vm1253_vm13 = vmor %vm1251_vm11, %vm1252_vm10  ;;  %vm1280_vm4 = vweird.f32 %v1568_v16 }
 0x8d6   :  { %v1248_v17 = vsub.f32 1.0, %v1247_v14  ;;  %vm1281_vm6 = vmor %vm1279_vm5, %vm1280_vm4 }
 0x8d7   :  { %v1276_v27 = vsub.f32 1.0, %v1275_v21 }
 0x8d8   :  { %v1249_v22 = vmul.f32 %v1566_v12, %v1248_v17 }
 0x8d9   :  { %v1277_v32 = vmul.f32 %v1568_v16, %v1276_v27 }
 0x8da   :  { %v1250_v23 = vadd.f32 %v1566_v12, %v1249_v22 }
 0x8db   :  { %v1278_v40 = vadd.f32 %v1568_v16, %v1277_v32 }
 0x8dc   :  { %v1254_v28 = vsel %vm1253_vm13, %v1566_v12, %v1250_v23 }
 0x8dd   :  { %v1259_v30 = vsel %vm1256_vm14, %v1258_v24, %v1254_v28 }
 0x8de   :  { %v1288_v34 = vmul.f32 %v1259_v30, %v2637_v35  ;;  %v1282_v35 = vsel %vm1281_vm6, %v1568_v16, %v1278_v40 }
 0x8df   :  { %v1287_v20 = vsel %vm1284_vm7, %v1286_v44, %v1282_v35 }
 0x8e0   :  { %1460 = vmatmul.msk.f32.vlgmr.msrb.gmra.mxu3 %vm493_vm1, %v1288_v34  ;;  %v1290_v47 = vmul.f32 %v1287_v20, %v2632_v31 }
 0x8e8   :  { %1461 = vmatmul.msk.f32.gmra.mxu3 %vm493_vm1, %v1289_v42 }
 0x8e9   :  { %v1080_v45 = vpop.f32.mrf.mxu3 }
 0x8ea   :  { %v1081_v46 = vadd.f32 %v1543_v43, %v1080_v45 }
 0x8ec   :  { %1089 = vst.msk [vmem:[#allocation37] sm:$0xff] %vm537_vm2, %v1081_v46 }
 0x8f0   :  { %1462 = vmatmul.msk.f32.gmra.mxu3 %vm493_vm1, %v1290_v47 }
 0x913   :  { %v1083_v48 = vpop.f32.mrf.mxu3 }
 0x914   :  { %v1084_v25 = vadd.f32 %v1543_v43, %v1083_v48 }
 0x916   :  { %1090 = vst.msk [vmem:[#allocation37 + $0x8] sm:$0xff] %vm537_vm2, %v1084_v25 }
 0x922   :  { %v1086_v49 = vpop.f32.mrf.mxu3 }
 0x923   :  { %v1087_v50 = vadd.f32 %v1543_v43, %v1086_v49 }
 0x925   :  { %1091 = vst.msk [vmem:[#allocation37 + $0x10] sm:$0xff] %vm537_vm2, %v1087_v50 }
 0x926   :  { %2120 = shalt.err (!%p2117_p2)
}
 0x927   :  { %1345 = dma.vmem_to_hbm [thread:$0]  %s1338_s0, 384, %s1340_s18, [#allocation4], %s2206_s15, %s2206_s15, %s2207_s16  }
 0x928   :  { %v1544_v31 = vld [vmem:[%s2390_s6] ss:$0 sm:$0xff]  ;;  %s2231_s24 = smov [#allocation38]   ;;  %s1352_s13 = sshll.u32 %s2400_s25, 4  ;;  %s1353_s13 = int_to_ptr.hbm [resolvable:$true] %s1352_s13 }
 0x929   :  { %s1350_s17 = sshll.u32 %s2231_s24, 4  ;;  %s2133_s6 = sshra.s32 %s1353_s13, 4  ;;  %s1351_s17 = int_to_ptr.vmem [resolvable:$true] %s1350_s17  ;;  %s2134_s6 = int_to_ptr.hbm [resolvable:$true] %s2133_s6 }
 0x92a   :  { %s2135_s30 = scalar_lea.hbm %s2134_s6, 24  ;;  %s2137_s22 = scalar_lea.hbm %s2400_s25, 24 }
 0x92b   :  { %p2136_p3 = scmp.ne.s32.totalorder %s2134_s6, %s2135_s30  ;;  %p2138_p4 = scmp.lt.s32.totalorder %s2134_s6, %s2400_s25 }
 0x92c   :  { %p2139_p5 = scmp.lt.s32.totalorder %s2137_s22, %s2135_s30 }
 0x92e   :  { %p2140_p6 = por %p2139_p5, %p2138_p4 }
 0x930   :  { %p2141_p7 = pnand %p2140_p6, %p2136_p3 }
 0x963   :  { %v1321_v51 = vpop.f32.mrf.mxu3 }
 0x964   :  { %v1322_v52 = vadd.f32 %v1544_v31, %v1321_v51 }
 0x966   :  { %1330 = vst.msk [vmem:[#allocation38] sm:$0xff] %vm537_vm2, %v1322_v52 }
 0x96b   :  { %v1324_v53 = vpop.f32.mrf.mxu3 }
 0x96c   :  { %v1325_v54 = vadd.f32 %v1544_v31, %v1324_v53 }
 0x96e   :  { %1331 = vst.msk [vmem:[#allocation38 + $0x8] sm:$0xff] %vm537_vm2, %v1325_v54 }
 0x973   :  { %v1327_v55 = vpop.f32.mrf.mxu3 }
 0x974   :  { %v1328_v56 = vadd.f32 %v1544_v31, %v1327_v55 }
 0x976   :  { %1332 = vst.msk [vmem:[#allocation38 + $0x10] sm:$0xff] %vm537_vm2, %v1328_v56 }
 0x977   :  { %2144 = shalt.err (!%p2141_p7)
}
 0x978   :  { %1358 = dma.vmem_to_hbm [thread:$0]  %s1351_s17, 384, %s1353_s13, [#allocation39], %s2206_s15, %s2206_s15, %s2207_s16  }
 0x979   :  { %2169 = dma.done.wait [#allocation4], 384  }
 0x97a   :  { %2170 = vsyncadd [#allocation4], 4294966912 }
 0x97b   :  { %2171 = dma.done.wait [#allocation39], 384  }
 0x97c   :  { %2172 = vsyncadd [#allocation39], 4294966912 }
 0x97d   :  { %1367 = vsyncpa [#allocation3], 1 }
 0x97e   :  { %1368 = vsyncpa [#allocation6], 1 }
 0x97f   :  { %1369 = vsyncpa [#allocation9], 1 }
 0x980   :  { %1370 = vsyncpa [#allocation12], 1 }
 0x981   :  { %1371 = vsyncpa [#allocation15], 1 }
 0x982   :  { %1372 = vsyncpa [#allocation18], 1 }
 0x983   :  { %1373 = vsyncpa [#allocation21], 1 }
 0x984   :  { %1374 = vsyncpa [#allocation24], 1 }
 0x985   :  { %1375 = vsyncpa [#allocation27], 1 }
 0x986   :  { %1376 = vsyncpa [#allocation30], 1 }
 0x987   :  { %1377 = vsyncpa [#allocation33], 1 }
 0x988   :  { %1378 = vsyncpa [#allocation36], 1 }
 0x989   :  { %1379 = vsyncpa [#allocation4], 1 }
 0x98a   :  { %1380 = vsyncpa [#allocation39], 1 }

</bundles_post_ra>
